<compile_context>
chip_gen: v7x
topology: tpu7x:2x2x1
jax: 0.10.0
libtpu: 0.0.40
codegen_flags: <defaults>
</compile_context>

<pallas_src>
import functools

import jax
import jax.numpy as jnp
from jax.experimental import pallas as pl
from jax.experimental.pallas import tpu as pltpu

LANE = 128
HID = 16
_NET_SIZE = 2 * HID + HID + HID + 1      # w1(2,16) + b1(16) + w2(16) + b2(1) = 65
_IDX_INV_TAU = 2 * _NET_SIZE             # 130  (holds 0.5 / tau)
_N_PARAMS = _IDX_INV_TAU + 1             # 131


def _ceil_to(a, m):
    return -(-a // m) * m


def _bf16_supported():
    """bf16 VALU exists on v6e/v7x; keep f32 on v5e/v4/... and off-TPU."""
    try:
        dev = jax.devices()[0]
        if dev.platform != "tpu":
            return False
        kind = dev.device_kind.lower()
        return not any(t in kind for t in ("v2", "v3", "v4", "v5"))
    except Exception:  # pragma: no cover - conservative fallback
        return False


def _mlp_2_16_1(params_ref, off, xc, dc, compute_dtype):
    """sum_k relu(x*w1[0,k] + d*w1[1,k] + b1[k]) * w2[k] + b2  (pure VPU unroll).

    Weights come from SMEM.  In the bf16 path each weight is splatted into a
    (1, LANE) row and cast with *vector* ops (scalar f32->bf16 converts are not
    a safe scalar-core lowering); the broadcast against the (bm, LANE) tile is
    a cheap sublane broadcast.  Accumulation is always f32.
    """
    bf16 = compute_dtype != jnp.float32

    def w(idx):
        if bf16:
            return jnp.full((1, LANE), params_ref[idx],
                            jnp.float32).astype(compute_dtype)
        return params_ref[idx]                      # f32 scalar (vs-form VALU op)

    acc = jnp.zeros(xc.shape, jnp.float32)
    for k in range(HID):                            # static unroll over 16 units
        h = xc * w(off + k) + dc * w(off + HID + k) + w(off + 2 * HID + k)
        h = jnp.maximum(h, 0)
        acc = acc + (h * w(off + 3 * HID + k)).astype(jnp.float32)
    return acc + params_ref[off + 4 * HID]          # final bias in f32


def _controller_kernel(params_ref, x_ref, d_ref, u_ref, *out_refs,
                       compute_dtype=jnp.float32):
    range_ref, soft_ref = out_refs[0], out_refs[1]

    x = x_ref[...]
    d = d_ref[...]
    xc = x.astype(compute_dtype)
    dc = d.astype(compute_dtype)

    # Range head: -0.4 + 2*sigmoid(z) == 0.6 + tanh(z/2); the 1/2 is folded into
    # this head's packed w2/b2, tanh runs on the EUP (VALU slack).
    z_r = _mlp_2_16_1(params_ref, _NET_SIZE, xc, dc, compute_dtype)
    range_ref[...] = 0.6 + jnp.tanh(z_r)

    # Gating head: sigmoid((logits+g)/tau) == 0.5 + 0.5*tanh(0.5*(logits+g)/tau);
    # params[_IDX_INV_TAU] already holds 0.5/tau.
    logits = _mlp_2_16_1(params_ref, 0, xc, dc, compute_dtype)
    u = u_ref[...]
    gumbel = -jnp.log(-jnp.log(u + 1e-10) + 1e-10)        # EUP
    pre = (logits + gumbel) * params_ref[_IDX_INV_TAU]
    soft_ref[...] = 0.5 + 0.5 * jnp.tanh(pre)

    if len(out_refs) == 3:
        # Pre-activation sign == (y_soft > 0.5) (tanh monotone, 0.5/tau > 0);
        # avoids a data dependence on the EUP result before the last store.
        out_refs[2][...] = (pre > 0.0).astype(jnp.float32)


def controller_range(x, d, net_params, range_params, *, tau=1.0, hard=False,
                     seed=0, block_rows=2048, use_bf16=None):
    """Forward pass of Controller_range.

    x, d : (..., 1) float32, same shape (concatenated feature dim = 2).
    net_params / range_params : (w1 (2,16), b1 (16,), w2 (16,1), b2 (1,)) stored
      in (in, out) orientation (already transposed vs torch.nn.Linear.weight).
    Returns (out_range, y) each with the same shape as x.
    """
    assert x.shape == d.shape and x.shape[-1] == 1
    orig_shape = x.shape
    xf = x.reshape(-1).astype(jnp.float32)
    df = d.reshape(-1).astype(jnp.float32)
    n = xf.shape[0]

    # Lane-dense (rows, 128) slab, tiled along rows.
    rows = max(8, _ceil_to(_ceil_to(n, LANE) // LANE, 8))
    if rows < 16:
        bm, ntiles = rows, 1
    else:
        # >= 2 grid tiles so both v7x TensorCores get work; balance tile sizes.
        ntiles = max(2, -(-rows // block_rows))
        bm = _ceil_to(-(-rows // ntiles), 8)
        rows = _ceil_to(rows, bm)
        ntiles = rows // bm
    n_pad = rows * LANE

    x2 = jnp.pad(xf, (0, n_pad - n)).reshape(rows, LANE)
    d2 = jnp.pad(df, (0, n_pad - n)).reshape(rows, LANE)
    # Uniform noise generated host-side (in-kernel HW PRNG has no CPU/interpret
    # lowering); matches torch.rand_like's single-Gumbel construction.
    u2 = jax.random.uniform(jax.random.PRNGKey(seed), (rows, LANE), jnp.float32)

    # Pack weights into one f32 SMEM vector; fold 0.5 into the range head's
    # w2/b2 (tanh identity) and store 0.5/tau as a single scalar.
    w1n, b1n, w2n, b2n = net_params
    w1r, b1r, w2r, b2r = range_params

    def _flat(a):
        return jnp.asarray(a, jnp.float32).reshape(-1)

    params = jnp.concatenate(
        [_flat(w1n), _flat(b1n), _flat(w2n), _flat(b2n),
         _flat(w1r), _flat(b1r), 0.5 * _flat(w2r), 0.5 * _flat(b2r),
         jnp.asarray([0.5 / float(tau)], jnp.float32)])
    assert params.shape[0] == _N_PARAMS

    num_out = 3 if hard else 2
    tile = lambda: pl.BlockSpec((bm, LANE), lambda i, *_: (i, 0))

    def _run(compute_dtype):
        grid_spec = pltpu.PrefetchScalarGridSpec(
            num_scalar_prefetch=1,                 # packed params -> SMEM
            grid=(ntiles,),
            in_specs=[tile(), tile(), tile()],
            out_specs=tuple(tile() for _ in range(num_out)),
        )
        return pl.pallas_call(
            functools.partial(_controller_kernel, compute_dtype=compute_dtype),
            out_shape=tuple(jax.ShapeDtypeStruct((rows, LANE), jnp.float32)
                            for _ in range(num_out)),
            grid_spec=grid_spec,
            compiler_params=pltpu.CompilerParams(
                dimension_semantics=("parallel",),   # megacore / v7x 2-TC split
                vmem_limit_bytes=32 * 1024 * 1024,   # safe on v5e/v6e/v7x
            ),
        )(params, x2, d2, u2)

    if use_bf16 is None:
        use_bf16 = _bf16_supported()
    if use_bf16:
        try:
            outs = jax.block_until_ready(_run(jnp.bfloat16))
        except Exception:
            # Conservative fallback: if the bf16 variant does not lower on this
            # toolchain/chip, re-run the reference f32 path.
            outs = _run(jnp.float32)
    else:
        outs = _run(jnp.float32)

    def unpad(a):
        return a.reshape(-1)[:n].reshape(orig_shape)

    out_range = unpad(outs[0])
    y_soft = unpad(outs[1])
    if hard:
        y_hard = unpad(outs[2])
        binary_out = jax.lax.stop_gradient(y_hard - y_soft) + y_soft
        return out_range, binary_out
    return out_range, y_soft


def _init_linear(key, fan_in, fan_out):
    kw, kb = jax.random.split(key)
    bound = 1.0 / jnp.sqrt(float(fan_in))
    w = jax.random.uniform(kw, (fan_in, fan_out), jnp.float32, -bound, bound)
    b = jax.random.uniform(kb, (fan_out,), jnp.float32, -bound, bound)
    return w, b


def _init_params(key):
    k1, k2, k3, k4 = jax.random.split(key, 4)
    w1n, b1n = _init_linear(k1, 2, HID)
    w2n, b2n = _init_linear(k2, HID, 1)
    w1r, b1r = _init_linear(k3, 2, HID)
    w2r, b2r = _init_linear(k4, HID, 1)
    return (w1n, b1n, w2n, b2n), (w1r, b1r, w2r, b2r)


if __name__ == "__main__":
    key = jax.random.PRNGKey(0)
    kx, kd, kp = jax.random.split(key, 3)
    net_params, range_params = _init_params(kp)

    B, S = 2, 8
    x = jax.random.normal(kx, (B, S, 1), jnp.float32)
    d = jax.random.normal(kd, (B, S, 1), jnp.float32)

    out_range, y_soft = controller_range(x, d, net_params, range_params,
                                         tau=1.0, hard=False, seed=0)
    out_range, y_soft = jax.block_until_ready((out_range, y_soft))

    # Pure-JAX reference for the deterministic range head.
    inp = jnp.concatenate([x, d], axis=2)
    w1r, b1r, w2r, b2r = range_params
    h = jnp.maximum(inp @ w1r + b1r, 0.0)
    range_ref = -0.4 + 2.0 * jax.nn.sigmoid(h @ w2r + b2r)

    # bf16 hidden layers (v6e/v7x) trade a little precision for ~2x VALU
    # throughput; use a relaxed tolerance there, strict 1e-5 on the f32 path.
    atol = 2e-2 if _bf16_supported() else 1e-5

    assert out_range.shape == (B, S, 1) and y_soft.shape == (B, S, 1)
    assert jnp.allclose(out_range, range_ref, atol=atol), "range head mismatch"
    assert bool(jnp.all(jnp.isfinite(y_soft)))
    assert bool(jnp.all((y_soft >= 0.0) & (y_soft <= 1.0)))

    # hard=True path (fused threshold output + straight-through estimator).
    out_range_h, binary = controller_range(x, d, net_params, range_params,
                                           tau=1.0, hard=True, seed=1)
    out_range_h, binary = jax.block_until_ready((out_range_h, binary))
    assert jnp.allclose(out_range_h, range_ref, atol=atol)
    assert bool(jnp.all((jnp.abs(binary) < 1e-4) | (jnp.abs(binary - 1.0) < 1e-4)))

    print("KERNEL_OK")
</pallas_src>

<mosaic_0001>
module attributes {stable_mosaic.version = 11 : i64} {
  func.func @_controller_kernel(%arg0: i32, %arg1: memref<131xf32, #tpu.memory_space<smem>>, %arg2: memref<8x128xf32, #tpu.memory_space<vmem>>, %arg3: memref<8x128xf32, #tpu.memory_space<vmem>>, %arg4: memref<8x128xf32, #tpu.memory_space<vmem>>, %arg5: memref<8x128xf32, #tpu.memory_space<vmem>>, %arg6: memref<8x128xf32, #tpu.memory_space<vmem>>) attributes {dimension_semantics = [#tpu.dimension_semantics<parallel>], iteration_bounds = array<i64: 1>, scalar_prefetch = 1 : i64, scratch_operands = 0 : i64, tpu.core_type = #tpu.core_type<tc>, window_params = [{transform_indices = @transform_0, window_bounds = array<i64: 8, 128>}, {transform_indices = @transform_1, window_bounds = array<i64: 8, 128>}, {transform_indices = @transform_2, window_bounds = array<i64: 8, 128>}, {transform_indices = @transform_3, window_bounds = array<i64: 8, 128>}, {transform_indices = @transform_4, window_bounds = array<i64: 8, 128>}]} {
    %c0 = arith.constant 0 : index
    %c0_0 = arith.constant 0 : index
    %0 = vector.load %arg2[%c0, %c0_0] : memref<8x128xf32, #tpu.memory_space<vmem>>, vector<8x128xf32>
    %c0_1 = arith.constant 0 : index
    %c0_2 = arith.constant 0 : index
    %1 = vector.load %arg3[%c0_1, %c0_2] : memref<8x128xf32, #tpu.memory_space<vmem>>, vector<8x128xf32>
    %cst = arith.constant 0.000000e+00 : f32
    %2 = vector.broadcast %cst : f32 to vector<8x128xf32>
    %c65 = arith.constant 65 : index
    %3 = memref.load %arg1[%c65] : memref<131xf32, #tpu.memory_space<smem>>
    %4 = vector.broadcast %3 : f32 to vector<8x128xf32>
    %5 = arith.mulf %0, %4 : vector<8x128xf32>
    %c81 = arith.constant 81 : index
    %6 = memref.load %arg1[%c81] : memref<131xf32, #tpu.memory_space<smem>>
    %7 = vector.broadcast %6 : f32 to vector<8x128xf32>
    %8 = arith.mulf %1, %7 : vector<8x128xf32>
    %9 = arith.addf %5, %8 : vector<8x128xf32>
    %c97 = arith.constant 97 : index
    %10 = memref.load %arg1[%c97] : memref<131xf32, #tpu.memory_space<smem>>
    %11 = vector.broadcast %10 : f32 to vector<8x128xf32>
    %12 = arith.addf %9, %11 : vector<8x128xf32>
    %cst_3 = arith.constant 0.000000e+00 : f32
    %13 = vector.broadcast %cst_3 : f32 to vector<8x128xf32>
    %14 = arith.maximumf %12, %13 : vector<8x128xf32>
    %c113 = arith.constant 113 : index
    %15 = memref.load %arg1[%c113] : memref<131xf32, #tpu.memory_space<smem>>
    %16 = vector.broadcast %15 : f32 to vector<8x128xf32>
    %17 = arith.mulf %14, %16 : vector<8x128xf32>
    %18 = arith.addf %2, %17 : vector<8x128xf32>
    %c66 = arith.constant 66 : index
    %19 = memref.load %arg1[%c66] : memref<131xf32, #tpu.memory_space<smem>>
    %20 = vector.broadcast %19 : f32 to vector<8x128xf32>
    %21 = arith.mulf %0, %20 : vector<8x128xf32>
    %c82 = arith.constant 82 : index
    %22 = memref.load %arg1[%c82] : memref<131xf32, #tpu.memory_space<smem>>
    %23 = vector.broadcast %22 : f32 to vector<8x128xf32>
    %24 = arith.mulf %1, %23 : vector<8x128xf32>
    %25 = arith.addf %21, %24 : vector<8x128xf32>
    %c98 = arith.constant 98 : index
    %26 = memref.load %arg1[%c98] : memref<131xf32, #tpu.memory_space<smem>>
    %27 = vector.broadcast %26 : f32 to vector<8x128xf32>
    %28 = arith.addf %25, %27 : vector<8x128xf32>
    %cst_4 = arith.constant 0.000000e+00 : f32
    %29 = vector.broadcast %cst_4 : f32 to vector<8x128xf32>
    %30 = arith.maximumf %28, %29 : vector<8x128xf32>
    %c114 = arith.constant 114 : index
    %31 = memref.load %arg1[%c114] : memref<131xf32, #tpu.memory_space<smem>>
    %32 = vector.broadcast %31 : f32 to vector<8x128xf32>
    %33 = arith.mulf %30, %32 : vector<8x128xf32>
    %34 = arith.addf %18, %33 : vector<8x128xf32>
    %c67 = arith.constant 67 : index
    %35 = memref.load %arg1[%c67] : memref<131xf32, #tpu.memory_space<smem>>
    %36 = vector.broadcast %35 : f32 to vector<8x128xf32>
    %37 = arith.mulf %0, %36 : vector<8x128xf32>
    %c83 = arith.constant 83 : index
    %38 = memref.load %arg1[%c83] : memref<131xf32, #tpu.memory_space<smem>>
    %39 = vector.broadcast %38 : f32 to vector<8x128xf32>
    %40 = arith.mulf %1, %39 : vector<8x128xf32>
    %41 = arith.addf %37, %40 : vector<8x128xf32>
    %c99 = arith.constant 99 : index
    %42 = memref.load %arg1[%c99] : memref<131xf32, #tpu.memory_space<smem>>
    %43 = vector.broadcast %42 : f32 to vector<8x128xf32>
    %44 = arith.addf %41, %43 : vector<8x128xf32>
    %cst_5 = arith.constant 0.000000e+00 : f32
    %45 = vector.broadcast %cst_5 : f32 to vector<8x128xf32>
    %46 = arith.maximumf %44, %45 : vector<8x128xf32>
    %c115 = arith.constant 115 : index
    %47 = memref.load %arg1[%c115] : memref<131xf32, #tpu.memory_space<smem>>
    %48 = vector.broadcast %47 : f32 to vector<8x128xf32>
    %49 = arith.mulf %46, %48 : vector<8x128xf32>
    %50 = arith.addf %34, %49 : vector<8x128xf32>
    %c68 = arith.constant 68 : index
    %51 = memref.load %arg1[%c68] : memref<131xf32, #tpu.memory_space<smem>>
    %52 = vector.broadcast %51 : f32 to vector<8x128xf32>
    %53 = arith.mulf %0, %52 : vector<8x128xf32>
    %c84 = arith.constant 84 : index
    %54 = memref.load %arg1[%c84] : memref<131xf32, #tpu.memory_space<smem>>
    %55 = vector.broadcast %54 : f32 to vector<8x128xf32>
    %56 = arith.mulf %1, %55 : vector<8x128xf32>
    %57 = arith.addf %53, %56 : vector<8x128xf32>
    %c100 = arith.constant 100 : index
    %58 = memref.load %arg1[%c100] : memref<131xf32, #tpu.memory_space<smem>>
    %59 = vector.broadcast %58 : f32 to vector<8x128xf32>
    %60 = arith.addf %57, %59 : vector<8x128xf32>
    %cst_6 = arith.constant 0.000000e+00 : f32
    %61 = vector.broadcast %cst_6 : f32 to vector<8x128xf32>
    %62 = arith.maximumf %60, %61 : vector<8x128xf32>
    %c116 = arith.constant 116 : index
    %63 = memref.load %arg1[%c116] : memref<131xf32, #tpu.memory_space<smem>>
    %64 = vector.broadcast %63 : f32 to vector<8x128xf32>
    %65 = arith.mulf %62, %64 : vector<8x128xf32>
    %66 = arith.addf %50, %65 : vector<8x128xf32>
    %c69 = arith.constant 69 : index
    %67 = memref.load %arg1[%c69] : memref<131xf32, #tpu.memory_space<smem>>
    %68 = vector.broadcast %67 : f32 to vector<8x128xf32>
    %69 = arith.mulf %0, %68 : vector<8x128xf32>
    %c85 = arith.constant 85 : index
    %70 = memref.load %arg1[%c85] : memref<131xf32, #tpu.memory_space<smem>>
    %71 = vector.broadcast %70 : f32 to vector<8x128xf32>
    %72 = arith.mulf %1, %71 : vector<8x128xf32>
    %73 = arith.addf %69, %72 : vector<8x128xf32>
    %c101 = arith.constant 101 : index
    %74 = memref.load %arg1[%c101] : memref<131xf32, #tpu.memory_space<smem>>
    %75 = vector.broadcast %74 : f32 to vector<8x128xf32>
    %76 = arith.addf %73, %75 : vector<8x128xf32>
    %cst_7 = arith.constant 0.000000e+00 : f32
    %77 = vector.broadcast %cst_7 : f32 to vector<8x128xf32>
    %78 = arith.maximumf %76, %77 : vector<8x128xf32>
    %c117 = arith.constant 117 : index
    %79 = memref.load %arg1[%c117] : memref<131xf32, #tpu.memory_space<smem>>
    %80 = vector.broadcast %79 : f32 to vector<8x128xf32>
    %81 = arith.mulf %78, %80 : vector<8x128xf32>
    %82 = arith.addf %66, %81 : vector<8x128xf32>
    %c70 = arith.constant 70 : index
    %83 = memref.load %arg1[%c70] : memref<131xf32, #tpu.memory_space<smem>>
    %84 = vector.broadcast %83 : f32 to vector<8x128xf32>
    %85 = arith.mulf %0, %84 : vector<8x128xf32>
    %c86 = arith.constant 86 : index
    %86 = memref.load %arg1[%c86] : memref<131xf32, #tpu.memory_space<smem>>
    %87 = vector.broadcast %86 : f32 to vector<8x128xf32>
    %88 = arith.mulf %1, %87 : vector<8x128xf32>
    %89 = arith.addf %85, %88 : vector<8x128xf32>
    %c102 = arith.constant 102 : index
    %90 = memref.load %arg1[%c102] : memref<131xf32, #tpu.memory_space<smem>>
    %91 = vector.broadcast %90 : f32 to vector<8x128xf32>
    %92 = arith.addf %89, %91 : vector<8x128xf32>
    %cst_8 = arith.constant 0.000000e+00 : f32
    %93 = vector.broadcast %cst_8 : f32 to vector<8x128xf32>
    %94 = arith.maximumf %92, %93 : vector<8x128xf32>
    %c118 = arith.constant 118 : index
    %95 = memref.load %arg1[%c118] : memref<131xf32, #tpu.memory_space<smem>>
    %96 = vector.broadcast %95 : f32 to vector<8x128xf32>
    %97 = arith.mulf %94, %96 : vector<8x128xf32>
    %98 = arith.addf %82, %97 : vector<8x128xf32>
    %c71 = arith.constant 71 : index
    %99 = memref.load %arg1[%c71] : memref<131xf32, #tpu.memory_space<smem>>
    %100 = vector.broadcast %99 : f32 to vector<8x128xf32>
    %101 = arith.mulf %0, %100 : vector<8x128xf32>
    %c87 = arith.constant 87 : index
    %102 = memref.load %arg1[%c87] : memref<131xf32, #tpu.memory_space<smem>>
    %103 = vector.broadcast %102 : f32 to vector<8x128xf32>
    %104 = arith.mulf %1, %103 : vector<8x128xf32>
    %105 = arith.addf %101, %104 : vector<8x128xf32>
    %c103 = arith.constant 103 : index
    %106 = memref.load %arg1[%c103] : memref<131xf32, #tpu.memory_space<smem>>
    %107 = vector.broadcast %106 : f32 to vector<8x128xf32>
    %108 = arith.addf %105, %107 : vector<8x128xf32>
    %cst_9 = arith.constant 0.000000e+00 : f32
    %109 = vector.broadcast %cst_9 : f32 to vector<8x128xf32>
    %110 = arith.maximumf %108, %109 : vector<8x128xf32>
    %c119 = arith.constant 119 : index
    %111 = memref.load %arg1[%c119] : memref<131xf32, #tpu.memory_space<smem>>
    %112 = vector.broadcast %111 : f32 to vector<8x128xf32>
    %113 = arith.mulf %110, %112 : vector<8x128xf32>
    %114 = arith.addf %98, %113 : vector<8x128xf32>
    %c72 = arith.constant 72 : index
    %115 = memref.load %arg1[%c72] : memref<131xf32, #tpu.memory_space<smem>>
    %116 = vector.broadcast %115 : f32 to vector<8x128xf32>
    %117 = arith.mulf %0, %116 : vector<8x128xf32>
    %c88 = arith.constant 88 : index
    %118 = memref.load %arg1[%c88] : memref<131xf32, #tpu.memory_space<smem>>
    %119 = vector.broadcast %118 : f32 to vector<8x128xf32>
    %120 = arith.mulf %1, %119 : vector<8x128xf32>
    %121 = arith.addf %117, %120 : vector<8x128xf32>
    %c104 = arith.constant 104 : index
    %122 = memref.load %arg1[%c104] : memref<131xf32, #tpu.memory_space<smem>>
    %123 = vector.broadcast %122 : f32 to vector<8x128xf32>
    %124 = arith.addf %121, %123 : vector<8x128xf32>
    %cst_10 = arith.constant 0.000000e+00 : f32
    %125 = vector.broadcast %cst_10 : f32 to vector<8x128xf32>
    %126 = arith.maximumf %124, %125 : vector<8x128xf32>
    %c120 = arith.constant 120 : index
    %127 = memref.load %arg1[%c120] : memref<131xf32, #tpu.memory_space<smem>>
    %128 = vector.broadcast %127 : f32 to vector<8x128xf32>
    %129 = arith.mulf %126, %128 : vector<8x128xf32>
    %130 = arith.addf %114, %129 : vector<8x128xf32>
    %c73 = arith.constant 73 : index
    %131 = memref.load %arg1[%c73] : memref<131xf32, #tpu.memory_space<smem>>
    %132 = vector.broadcast %131 : f32 to vector<8x128xf32>
    %133 = arith.mulf %0, %132 : vector<8x128xf32>
    %c89 = arith.constant 89 : index
    %134 = memref.load %arg1[%c89] : memref<131xf32, #tpu.memory_space<smem>>
    %135 = vector.broadcast %134 : f32 to vector<8x128xf32>
    %136 = arith.mulf %1, %135 : vector<8x128xf32>
    %137 = arith.addf %133, %136 : vector<8x128xf32>
    %c105 = arith.constant 105 : index
    %138 = memref.load %arg1[%c105] : memref<131xf32, #tpu.memory_space<smem>>
    %139 = vector.broadcast %138 : f32 to vector<8x128xf32>
    %140 = arith.addf %137, %139 : vector<8x128xf32>
    %cst_11 = arith.constant 0.000000e+00 : f32
    %141 = vector.broadcast %cst_11 : f32 to vector<8x128xf32>
    %142 = arith.maximumf %140, %141 : vector<8x128xf32>
    %c121 = arith.constant 121 : index
    %143 = memref.load %arg1[%c121] : memref<131xf32, #tpu.memory_space<smem>>
    %144 = vector.broadcast %143 : f32 to vector<8x128xf32>
    %145 = arith.mulf %142, %144 : vector<8x128xf32>
    %146 = arith.addf %130, %145 : vector<8x128xf32>
    %c74 = arith.constant 74 : index
    %147 = memref.load %arg1[%c74] : memref<131xf32, #tpu.memory_space<smem>>
    %148 = vector.broadcast %147 : f32 to vector<8x128xf32>
    %149 = arith.mulf %0, %148 : vector<8x128xf32>
    %c90 = arith.constant 90 : index
    %150 = memref.load %arg1[%c90] : memref<131xf32, #tpu.memory_space<smem>>
    %151 = vector.broadcast %150 : f32 to vector<8x128xf32>
    %152 = arith.mulf %1, %151 : vector<8x128xf32>
    %153 = arith.addf %149, %152 : vector<8x128xf32>
    %c106 = arith.constant 106 : index
    %154 = memref.load %arg1[%c106] : memref<131xf32, #tpu.memory_space<smem>>
    %155 = vector.broadcast %154 : f32 to vector<8x128xf32>
    %156 = arith.addf %153, %155 : vector<8x128xf32>
    %cst_12 = arith.constant 0.000000e+00 : f32
    %157 = vector.broadcast %cst_12 : f32 to vector<8x128xf32>
    %158 = arith.maximumf %156, %157 : vector<8x128xf32>
    %c122 = arith.constant 122 : index
    %159 = memref.load %arg1[%c122] : memref<131xf32, #tpu.memory_space<smem>>
    %160 = vector.broadcast %159 : f32 to vector<8x128xf32>
    %161 = arith.mulf %158, %160 : vector<8x128xf32>
    %162 = arith.addf %146, %161 : vector<8x128xf32>
    %c75 = arith.constant 75 : index
    %163 = memref.load %arg1[%c75] : memref<131xf32, #tpu.memory_space<smem>>
    %164 = vector.broadcast %163 : f32 to vector<8x128xf32>
    %165 = arith.mulf %0, %164 : vector<8x128xf32>
    %c91 = arith.constant 91 : index
    %166 = memref.load %arg1[%c91] : memref<131xf32, #tpu.memory_space<smem>>
    %167 = vector.broadcast %166 : f32 to vector<8x128xf32>
    %168 = arith.mulf %1, %167 : vector<8x128xf32>
    %169 = arith.addf %165, %168 : vector<8x128xf32>
    %c107 = arith.constant 107 : index
    %170 = memref.load %arg1[%c107] : memref<131xf32, #tpu.memory_space<smem>>
    %171 = vector.broadcast %170 : f32 to vector<8x128xf32>
    %172 = arith.addf %169, %171 : vector<8x128xf32>
    %cst_13 = arith.constant 0.000000e+00 : f32
    %173 = vector.broadcast %cst_13 : f32 to vector<8x128xf32>
    %174 = arith.maximumf %172, %173 : vector<8x128xf32>
    %c123 = arith.constant 123 : index
    %175 = memref.load %arg1[%c123] : memref<131xf32, #tpu.memory_space<smem>>
    %176 = vector.broadcast %175 : f32 to vector<8x128xf32>
    %177 = arith.mulf %174, %176 : vector<8x128xf32>
    %178 = arith.addf %162, %177 : vector<8x128xf32>
    %c76 = arith.constant 76 : index
    %179 = memref.load %arg1[%c76] : memref<131xf32, #tpu.memory_space<smem>>
    %180 = vector.broadcast %179 : f32 to vector<8x128xf32>
    %181 = arith.mulf %0, %180 : vector<8x128xf32>
    %c92 = arith.constant 92 : index
    %182 = memref.load %arg1[%c92] : memref<131xf32, #tpu.memory_space<smem>>
    %183 = vector.broadcast %182 : f32 to vector<8x128xf32>
    %184 = arith.mulf %1, %183 : vector<8x128xf32>
    %185 = arith.addf %181, %184 : vector<8x128xf32>
    %c108 = arith.constant 108 : index
    %186 = memref.load %arg1[%c108] : memref<131xf32, #tpu.memory_space<smem>>
    %187 = vector.broadcast %186 : f32 to vector<8x128xf32>
    %188 = arith.addf %185, %187 : vector<8x128xf32>
    %cst_14 = arith.constant 0.000000e+00 : f32
    %189 = vector.broadcast %cst_14 : f32 to vector<8x128xf32>
    %190 = arith.maximumf %188, %189 : vector<8x128xf32>
    %c124 = arith.constant 124 : index
    %191 = memref.load %arg1[%c124] : memref<131xf32, #tpu.memory_space<smem>>
    %192 = vector.broadcast %191 : f32 to vector<8x128xf32>
    %193 = arith.mulf %190, %192 : vector<8x128xf32>
    %194 = arith.addf %178, %193 : vector<8x128xf32>
    %c77 = arith.constant 77 : index
    %195 = memref.load %arg1[%c77] : memref<131xf32, #tpu.memory_space<smem>>
    %196 = vector.broadcast %195 : f32 to vector<8x128xf32>
    %197 = arith.mulf %0, %196 : vector<8x128xf32>
    %c93 = arith.constant 93 : index
    %198 = memref.load %arg1[%c93] : memref<131xf32, #tpu.memory_space<smem>>
    %199 = vector.broadcast %198 : f32 to vector<8x128xf32>
    %200 = arith.mulf %1, %199 : vector<8x128xf32>
    %201 = arith.addf %197, %200 : vector<8x128xf32>
    %c109 = arith.constant 109 : index
    %202 = memref.load %arg1[%c109] : memref<131xf32, #tpu.memory_space<smem>>
    %203 = vector.broadcast %202 : f32 to vector<8x128xf32>
    %204 = arith.addf %201, %203 : vector<8x128xf32>
    %cst_15 = arith.constant 0.000000e+00 : f32
    %205 = vector.broadcast %cst_15 : f32 to vector<8x128xf32>
    %206 = arith.maximumf %204, %205 : vector<8x128xf32>
    %c125 = arith.constant 125 : index
    %207 = memref.load %arg1[%c125] : memref<131xf32, #tpu.memory_space<smem>>
    %208 = vector.broadcast %207 : f32 to vector<8x128xf32>
    %209 = arith.mulf %206, %208 : vector<8x128xf32>
    %210 = arith.addf %194, %209 : vector<8x128xf32>
    %c78 = arith.constant 78 : index
    %211 = memref.load %arg1[%c78] : memref<131xf32, #tpu.memory_space<smem>>
    %212 = vector.broadcast %211 : f32 to vector<8x128xf32>
    %213 = arith.mulf %0, %212 : vector<8x128xf32>
    %c94 = arith.constant 94 : index
    %214 = memref.load %arg1[%c94] : memref<131xf32, #tpu.memory_space<smem>>
    %215 = vector.broadcast %214 : f32 to vector<8x128xf32>
    %216 = arith.mulf %1, %215 : vector<8x128xf32>
    %217 = arith.addf %213, %216 : vector<8x128xf32>
    %c110 = arith.constant 110 : index
    %218 = memref.load %arg1[%c110] : memref<131xf32, #tpu.memory_space<smem>>
    %219 = vector.broadcast %218 : f32 to vector<8x128xf32>
    %220 = arith.addf %217, %219 : vector<8x128xf32>
    %cst_16 = arith.constant 0.000000e+00 : f32
    %221 = vector.broadcast %cst_16 : f32 to vector<8x128xf32>
    %222 = arith.maximumf %220, %221 : vector<8x128xf32>
    %c126 = arith.constant 126 : index
    %223 = memref.load %arg1[%c126] : memref<131xf32, #tpu.memory_space<smem>>
    %224 = vector.broadcast %223 : f32 to vector<8x128xf32>
    %225 = arith.mulf %222, %224 : vector<8x128xf32>
    %226 = arith.addf %210, %225 : vector<8x128xf32>
    %c79 = arith.constant 79 : index
    %227 = memref.load %arg1[%c79] : memref<131xf32, #tpu.memory_space<smem>>
    %228 = vector.broadcast %227 : f32 to vector<8x128xf32>
    %229 = arith.mulf %0, %228 : vector<8x128xf32>
    %c95 = arith.constant 95 : index
    %230 = memref.load %arg1[%c95] : memref<131xf32, #tpu.memory_space<smem>>
    %231 = vector.broadcast %230 : f32 to vector<8x128xf32>
    %232 = arith.mulf %1, %231 : vector<8x128xf32>
    %233 = arith.addf %229, %232 : vector<8x128xf32>
    %c111 = arith.constant 111 : index
    %234 = memref.load %arg1[%c111] : memref<131xf32, #tpu.memory_space<smem>>
    %235 = vector.broadcast %234 : f32 to vector<8x128xf32>
    %236 = arith.addf %233, %235 : vector<8x128xf32>
    %cst_17 = arith.constant 0.000000e+00 : f32
    %237 = vector.broadcast %cst_17 : f32 to vector<8x128xf32>
    %238 = arith.maximumf %236, %237 : vector<8x128xf32>
    %c127 = arith.constant 127 : index
    %239 = memref.load %arg1[%c127] : memref<131xf32, #tpu.memory_space<smem>>
    %240 = vector.broadcast %239 : f32 to vector<8x128xf32>
    %241 = arith.mulf %238, %240 : vector<8x128xf32>
    %242 = arith.addf %226, %241 : vector<8x128xf32>
    %c80 = arith.constant 80 : index
    %243 = memref.load %arg1[%c80] : memref<131xf32, #tpu.memory_space<smem>>
    %244 = vector.broadcast %243 : f32 to vector<8x128xf32>
    %245 = arith.mulf %0, %244 : vector<8x128xf32>
    %c96 = arith.constant 96 : index
    %246 = memref.load %arg1[%c96] : memref<131xf32, #tpu.memory_space<smem>>
    %247 = vector.broadcast %246 : f32 to vector<8x128xf32>
    %248 = arith.mulf %1, %247 : vector<8x128xf32>
    %249 = arith.addf %245, %248 : vector<8x128xf32>
    %c112 = arith.constant 112 : index
    %250 = memref.load %arg1[%c112] : memref<131xf32, #tpu.memory_space<smem>>
    %251 = vector.broadcast %250 : f32 to vector<8x128xf32>
    %252 = arith.addf %249, %251 : vector<8x128xf32>
    %cst_18 = arith.constant 0.000000e+00 : f32
    %253 = vector.broadcast %cst_18 : f32 to vector<8x128xf32>
    %254 = arith.maximumf %252, %253 : vector<8x128xf32>
    %c128 = arith.constant 128 : index
    %255 = memref.load %arg1[%c128] : memref<131xf32, #tpu.memory_space<smem>>
    %256 = vector.broadcast %255 : f32 to vector<8x128xf32>
    %257 = arith.mulf %254, %256 : vector<8x128xf32>
    %258 = arith.addf %242, %257 : vector<8x128xf32>
    %c129 = arith.constant 129 : index
    %259 = memref.load %arg1[%c129] : memref<131xf32, #tpu.memory_space<smem>>
    %260 = vector.broadcast %259 : f32 to vector<8x128xf32>
    %261 = arith.addf %258, %260 : vector<8x128xf32>
    %262 = math.tanh %261 : vector<8x128xf32>
    %cst_19 = arith.constant 6.000000e-01 : f32
    %263 = vector.broadcast %cst_19 : f32 to vector<8x128xf32>
    %264 = arith.addf %263, %262 : vector<8x128xf32>
    %c0_20 = arith.constant 0 : index
    %c0_21 = arith.constant 0 : index
    %265 = vector.load %arg5[%c0_20, %c0_21] : memref<8x128xf32, #tpu.memory_space<vmem>>, vector<8x128xf32>
    tpu.vector_store %arg5[%c0_20, %c0_21], %264 {strides = array<i32>} : memref<8x128xf32, #tpu.memory_space<vmem>>, vector<8x128xf32>,
    %cst_22 = arith.constant 0.000000e+00 : f32
    %266 = vector.broadcast %cst_22 : f32 to vector<8x128xf32>
    %c0_23 = arith.constant 0 : index
    %267 = memref.load %arg1[%c0_23] : memref<131xf32, #tpu.memory_space<smem>>
    %268 = vector.broadcast %267 : f32 to vector<8x128xf32>
    %269 = arith.mulf %0, %268 : vector<8x128xf32>
    %c16 = arith.constant 16 : index
    %270 = memref.load %arg1[%c16] : memref<131xf32, #tpu.memory_space<smem>>
    %271 = vector.broadcast %270 : f32 to vector<8x128xf32>
    %272 = arith.mulf %1, %271 : vector<8x128xf32>
    %273 = arith.addf %269, %272 : vector<8x128xf32>
    %c32 = arith.constant 32 : index
    %274 = memref.load %arg1[%c32] : memref<131xf32, #tpu.memory_space<smem>>
    %275 = vector.broadcast %274 : f32 to vector<8x128xf32>
    %276 = arith.addf %273, %275 : vector<8x128xf32>
    %cst_24 = arith.constant 0.000000e+00 : f32
    %277 = vector.broadcast %cst_24 : f32 to vector<8x128xf32>
    %278 = arith.maximumf %276, %277 : vector<8x128xf32>
    %c48 = arith.constant 48 : index
    %279 = memref.load %arg1[%c48] : memref<131xf32, #tpu.memory_space<smem>>
    %280 = vector.broadcast %279 : f32 to vector<8x128xf32>
    %281 = arith.mulf %278, %280 : vector<8x128xf32>
    %282 = arith.addf %266, %281 : vector<8x128xf32>
    %c1 = arith.constant 1 : index
    %283 = memref.load %arg1[%c1] : memref<131xf32, #tpu.memory_space<smem>>
    %284 = vector.broadcast %283 : f32 to vector<8x128xf32>
    %285 = arith.mulf %0, %284 : vector<8x128xf32>
    %c17 = arith.constant 17 : index
    %286 = memref.load %arg1[%c17] : memref<131xf32, #tpu.memory_space<smem>>
    %287 = vector.broadcast %286 : f32 to vector<8x128xf32>
    %288 = arith.mulf %1, %287 : vector<8x128xf32>
    %289 = arith.addf %285, %288 : vector<8x128xf32>
    %c33 = arith.constant 33 : index
    %290 = memref.load %arg1[%c33] : memref<131xf32, #tpu.memory_space<smem>>
    %291 = vector.broadcast %290 : f32 to vector<8x128xf32>
    %292 = arith.addf %289, %291 : vector<8x128xf32>
    %cst_25 = arith.constant 0.000000e+00 : f32
    %293 = vector.broadcast %cst_25 : f32 to vector<8x128xf32>
    %294 = arith.maximumf %292, %293 : vector<8x128xf32>
    %c49 = arith.constant 49 : index
    %295 = memref.load %arg1[%c49] : memref<131xf32, #tpu.memory_space<smem>>
    %296 = vector.broadcast %295 : f32 to vector<8x128xf32>
    %297 = arith.mulf %294, %296 : vector<8x128xf32>
    %298 = arith.addf %282, %297 : vector<8x128xf32>
    %c2 = arith.constant 2 : index
    %299 = memref.load %arg1[%c2] : memref<131xf32, #tpu.memory_space<smem>>
    %300 = vector.broadcast %299 : f32 to vector<8x128xf32>
    %301 = arith.mulf %0, %300 : vector<8x128xf32>
    %c18 = arith.constant 18 : index
    %302 = memref.load %arg1[%c18] : memref<131xf32, #tpu.memory_space<smem>>
    %303 = vector.broadcast %302 : f32 to vector<8x128xf32>
    %304 = arith.mulf %1, %303 : vector<8x128xf32>
    %305 = arith.addf %301, %304 : vector<8x128xf32>
    %c34 = arith.constant 34 : index
    %306 = memref.load %arg1[%c34] : memref<131xf32, #tpu.memory_space<smem>>
    %307 = vector.broadcast %306 : f32 to vector<8x128xf32>
    %308 = arith.addf %305, %307 : vector<8x128xf32>
    %cst_26 = arith.constant 0.000000e+00 : f32
    %309 = vector.broadcast %cst_26 : f32 to vector<8x128xf32>
    %310 = arith.maximumf %308, %309 : vector<8x128xf32>
    %c50 = arith.constant 50 : index
    %311 = memref.load %arg1[%c50] : memref<131xf32, #tpu.memory_space<smem>>
    %312 = vector.broadcast %311 : f32 to vector<8x128xf32>
    %313 = arith.mulf %310, %312 : vector<8x128xf32>
    %314 = arith.addf %298, %313 : vector<8x128xf32>
    %c3 = arith.constant 3 : index
    %315 = memref.load %arg1[%c3] : memref<131xf32, #tpu.memory_space<smem>>
    %316 = vector.broadcast %315 : f32 to vector<8x128xf32>
    %317 = arith.mulf %0, %316 : vector<8x128xf32>
    %c19 = arith.constant 19 : index
    %318 = memref.load %arg1[%c19] : memref<131xf32, #tpu.memory_space<smem>>
    %319 = vector.broadcast %318 : f32 to vector<8x128xf32>
    %320 = arith.mulf %1, %319 : vector<8x128xf32>
    %321 = arith.addf %317, %320 : vector<8x128xf32>
    %c35 = arith.constant 35 : index
    %322 = memref.load %arg1[%c35] : memref<131xf32, #tpu.memory_space<smem>>
    %323 = vector.broadcast %322 : f32 to vector<8x128xf32>
    %324 = arith.addf %321, %323 : vector<8x128xf32>
    %cst_27 = arith.constant 0.000000e+00 : f32
    %325 = vector.broadcast %cst_27 : f32 to vector<8x128xf32>
    %326 = arith.maximumf %324, %325 : vector<8x128xf32>
    %c51 = arith.constant 51 : index
    %327 = memref.load %arg1[%c51] : memref<131xf32, #tpu.memory_space<smem>>
    %328 = vector.broadcast %327 : f32 to vector<8x128xf32>
    %329 = arith.mulf %326, %328 : vector<8x128xf32>
    %330 = arith.addf %314, %329 : vector<8x128xf32>
    %c4 = arith.constant 4 : index
    %331 = memref.load %arg1[%c4] : memref<131xf32, #tpu.memory_space<smem>>
    %332 = vector.broadcast %331 : f32 to vector<8x128xf32>
    %333 = arith.mulf %0, %332 : vector<8x128xf32>
    %c20 = arith.constant 20 : index
    %334 = memref.load %arg1[%c20] : memref<131xf32, #tpu.memory_space<smem>>
    %335 = vector.broadcast %334 : f32 to vector<8x128xf32>
    %336 = arith.mulf %1, %335 : vector<8x128xf32>
    %337 = arith.addf %333, %336 : vector<8x128xf32>
    %c36 = arith.constant 36 : index
    %338 = memref.load %arg1[%c36] : memref<131xf32, #tpu.memory_space<smem>>
    %339 = vector.broadcast %338 : f32 to vector<8x128xf32>
    %340 = arith.addf %337, %339 : vector<8x128xf32>
    %cst_28 = arith.constant 0.000000e+00 : f32
    %341 = vector.broadcast %cst_28 : f32 to vector<8x128xf32>
    %342 = arith.maximumf %340, %341 : vector<8x128xf32>
    %c52 = arith.constant 52 : index
    %343 = memref.load %arg1[%c52] : memref<131xf32, #tpu.memory_space<smem>>
    %344 = vector.broadcast %343 : f32 to vector<8x128xf32>
    %345 = arith.mulf %342, %344 : vector<8x128xf32>
    %346 = arith.addf %330, %345 : vector<8x128xf32>
    %c5 = arith.constant 5 : index
    %347 = memref.load %arg1[%c5] : memref<131xf32, #tpu.memory_space<smem>>
    %348 = vector.broadcast %347 : f32 to vector<8x128xf32>
    %349 = arith.mulf %0, %348 : vector<8x128xf32>
    %c21 = arith.constant 21 : index
    %350 = memref.load %arg1[%c21] : memref<131xf32, #tpu.memory_space<smem>>
    %351 = vector.broadcast %350 : f32 to vector<8x128xf32>
    %352 = arith.mulf %1, %351 : vector<8x128xf32>
    %353 = arith.addf %349, %352 : vector<8x128xf32>
    %c37 = arith.constant 37 : index
    %354 = memref.load %arg1[%c37] : memref<131xf32, #tpu.memory_space<smem>>
    %355 = vector.broadcast %354 : f32 to vector<8x128xf32>
    %356 = arith.addf %353, %355 : vector<8x128xf32>
    %cst_29 = arith.constant 0.000000e+00 : f32
    %357 = vector.broadcast %cst_29 : f32 to vector<8x128xf32>
    %358 = arith.maximumf %356, %357 : vector<8x128xf32>
    %c53 = arith.constant 53 : index
    %359 = memref.load %arg1[%c53] : memref<131xf32, #tpu.memory_space<smem>>
    %360 = vector.broadcast %359 : f32 to vector<8x128xf32>
    %361 = arith.mulf %358, %360 : vector<8x128xf32>
    %362 = arith.addf %346, %361 : vector<8x128xf32>
    %c6 = arith.constant 6 : index
    %363 = memref.load %arg1[%c6] : memref<131xf32, #tpu.memory_space<smem>>
    %364 = vector.broadcast %363 : f32 to vector<8x128xf32>
    %365 = arith.mulf %0, %364 : vector<8x128xf32>
    %c22 = arith.constant 22 : index
    %366 = memref.load %arg1[%c22] : memref<131xf32, #tpu.memory_space<smem>>
    %367 = vector.broadcast %366 : f32 to vector<8x128xf32>
    %368 = arith.mulf %1, %367 : vector<8x128xf32>
    %369 = arith.addf %365, %368 : vector<8x128xf32>
    %c38 = arith.constant 38 : index
    %370 = memref.load %arg1[%c38] : memref<131xf32, #tpu.memory_space<smem>>
    %371 = vector.broadcast %370 : f32 to vector<8x128xf32>
    %372 = arith.addf %369, %371 : vector<8x128xf32>
    %cst_30 = arith.constant 0.000000e+00 : f32
    %373 = vector.broadcast %cst_30 : f32 to vector<8x128xf32>
    %374 = arith.maximumf %372, %373 : vector<8x128xf32>
    %c54 = arith.constant 54 : index
    %375 = memref.load %arg1[%c54] : memref<131xf32, #tpu.memory_space<smem>>
    %376 = vector.broadcast %375 : f32 to vector<8x128xf32>
    %377 = arith.mulf %374, %376 : vector<8x128xf32>
    %378 = arith.addf %362, %377 : vector<8x128xf32>
    %c7 = arith.constant 7 : index
    %379 = memref.load %arg1[%c7] : memref<131xf32, #tpu.memory_space<smem>>
    %380 = vector.broadcast %379 : f32 to vector<8x128xf32>
    %381 = arith.mulf %0, %380 : vector<8x128xf32>
    %c23 = arith.constant 23 : index
    %382 = memref.load %arg1[%c23] : memref<131xf32, #tpu.memory_space<smem>>
    %383 = vector.broadcast %382 : f32 to vector<8x128xf32>
    %384 = arith.mulf %1, %383 : vector<8x128xf32>
    %385 = arith.addf %381, %384 : vector<8x128xf32>
    %c39 = arith.constant 39 : index
    %386 = memref.load %arg1[%c39] : memref<131xf32, #tpu.memory_space<smem>>
    %387 = vector.broadcast %386 : f32 to vector<8x128xf32>
    %388 = arith.addf %385, %387 : vector<8x128xf32>
    %cst_31 = arith.constant 0.000000e+00 : f32
    %389 = vector.broadcast %cst_31 : f32 to vector<8x128xf32>
    %390 = arith.maximumf %388, %389 : vector<8x128xf32>
    %c55 = arith.constant 55 : index
    %391 = memref.load %arg1[%c55] : memref<131xf32, #tpu.memory_space<smem>>
    %392 = vector.broadcast %391 : f32 to vector<8x128xf32>
    %393 = arith.mulf %390, %392 : vector<8x128xf32>
    %394 = arith.addf %378, %393 : vector<8x128xf32>
    %c8 = arith.constant 8 : index
    %395 = memref.load %arg1[%c8] : memref<131xf32, #tpu.memory_space<smem>>
    %396 = vector.broadcast %395 : f32 to vector<8x128xf32>
    %397 = arith.mulf %0, %396 : vector<8x128xf32>
    %c24 = arith.constant 24 : index
    %398 = memref.load %arg1[%c24] : memref<131xf32, #tpu.memory_space<smem>>
    %399 = vector.broadcast %398 : f32 to vector<8x128xf32>
    %400 = arith.mulf %1, %399 : vector<8x128xf32>
    %401 = arith.addf %397, %400 : vector<8x128xf32>
    %c40 = arith.constant 40 : index
    %402 = memref.load %arg1[%c40] : memref<131xf32, #tpu.memory_space<smem>>
    %403 = vector.broadcast %402 : f32 to vector<8x128xf32>
    %404 = arith.addf %401, %403 : vector<8x128xf32>
    %cst_32 = arith.constant 0.000000e+00 : f32
    %405 = vector.broadcast %cst_32 : f32 to vector<8x128xf32>
    %406 = arith.maximumf %404, %405 : vector<8x128xf32>
    %c56 = arith.constant 56 : index
    %407 = memref.load %arg1[%c56] : memref<131xf32, #tpu.memory_space<smem>>
    %408 = vector.broadcast %407 : f32 to vector<8x128xf32>
    %409 = arith.mulf %406, %408 : vector<8x128xf32>
    %410 = arith.addf %394, %409 : vector<8x128xf32>
    %c9 = arith.constant 9 : index
    %411 = memref.load %arg1[%c9] : memref<131xf32, #tpu.memory_space<smem>>
    %412 = vector.broadcast %411 : f32 to vector<8x128xf32>
    %413 = arith.mulf %0, %412 : vector<8x128xf32>
    %c25 = arith.constant 25 : index
    %414 = memref.load %arg1[%c25] : memref<131xf32, #tpu.memory_space<smem>>
    %415 = vector.broadcast %414 : f32 to vector<8x128xf32>
    %416 = arith.mulf %1, %415 : vector<8x128xf32>
    %417 = arith.addf %413, %416 : vector<8x128xf32>
    %c41 = arith.constant 41 : index
    %418 = memref.load %arg1[%c41] : memref<131xf32, #tpu.memory_space<smem>>
    %419 = vector.broadcast %418 : f32 to vector<8x128xf32>
    %420 = arith.addf %417, %419 : vector<8x128xf32>
    %cst_33 = arith.constant 0.000000e+00 : f32
    %421 = vector.broadcast %cst_33 : f32 to vector<8x128xf32>
    %422 = arith.maximumf %420, %421 : vector<8x128xf32>
    %c57 = arith.constant 57 : index
    %423 = memref.load %arg1[%c57] : memref<131xf32, #tpu.memory_space<smem>>
    %424 = vector.broadcast %423 : f32 to vector<8x128xf32>
    %425 = arith.mulf %422, %424 : vector<8x128xf32>
    %426 = arith.addf %410, %425 : vector<8x128xf32>
    %c10 = arith.constant 10 : index
    %427 = memref.load %arg1[%c10] : memref<131xf32, #tpu.memory_space<smem>>
    %428 = vector.broadcast %427 : f32 to vector<8x128xf32>
    %429 = arith.mulf %0, %428 : vector<8x128xf32>
    %c26 = arith.constant 26 : index
    %430 = memref.load %arg1[%c26] : memref<131xf32, #tpu.memory_space<smem>>
    %431 = vector.broadcast %430 : f32 to vector<8x128xf32>
    %432 = arith.mulf %1, %431 : vector<8x128xf32>
    %433 = arith.addf %429, %432 : vector<8x128xf32>
    %c42 = arith.constant 42 : index
    %434 = memref.load %arg1[%c42] : memref<131xf32, #tpu.memory_space<smem>>
    %435 = vector.broadcast %434 : f32 to vector<8x128xf32>
    %436 = arith.addf %433, %435 : vector<8x128xf32>
    %cst_34 = arith.constant 0.000000e+00 : f32
    %437 = vector.broadcast %cst_34 : f32 to vector<8x128xf32>
    %438 = arith.maximumf %436, %437 : vector<8x128xf32>
    %c58 = arith.constant 58 : index
    %439 = memref.load %arg1[%c58] : memref<131xf32, #tpu.memory_space<smem>>
    %440 = vector.broadcast %439 : f32 to vector<8x128xf32>
    %441 = arith.mulf %438, %440 : vector<8x128xf32>
    %442 = arith.addf %426, %441 : vector<8x128xf32>
    %c11 = arith.constant 11 : index
    %443 = memref.load %arg1[%c11] : memref<131xf32, #tpu.memory_space<smem>>
    %444 = vector.broadcast %443 : f32 to vector<8x128xf32>
    %445 = arith.mulf %0, %444 : vector<8x128xf32>
    %c27 = arith.constant 27 : index
    %446 = memref.load %arg1[%c27] : memref<131xf32, #tpu.memory_space<smem>>
    %447 = vector.broadcast %446 : f32 to vector<8x128xf32>
    %448 = arith.mulf %1, %447 : vector<8x128xf32>
    %449 = arith.addf %445, %448 : vector<8x128xf32>
    %c43 = arith.constant 43 : index
    %450 = memref.load %arg1[%c43] : memref<131xf32, #tpu.memory_space<smem>>
    %451 = vector.broadcast %450 : f32 to vector<8x128xf32>
    %452 = arith.addf %449, %451 : vector<8x128xf32>
    %cst_35 = arith.constant 0.000000e+00 : f32
    %453 = vector.broadcast %cst_35 : f32 to vector<8x128xf32>
    %454 = arith.maximumf %452, %453 : vector<8x128xf32>
    %c59 = arith.constant 59 : index
    %455 = memref.load %arg1[%c59] : memref<131xf32, #tpu.memory_space<smem>>
    %456 = vector.broadcast %455 : f32 to vector<8x128xf32>
    %457 = arith.mulf %454, %456 : vector<8x128xf32>
    %458 = arith.addf %442, %457 : vector<8x128xf32>
    %c12 = arith.constant 12 : index
    %459 = memref.load %arg1[%c12] : memref<131xf32, #tpu.memory_space<smem>>
    %460 = vector.broadcast %459 : f32 to vector<8x128xf32>
    %461 = arith.mulf %0, %460 : vector<8x128xf32>
    %c28 = arith.constant 28 : index
    %462 = memref.load %arg1[%c28] : memref<131xf32, #tpu.memory_space<smem>>
    %463 = vector.broadcast %462 : f32 to vector<8x128xf32>
    %464 = arith.mulf %1, %463 : vector<8x128xf32>
    %465 = arith.addf %461, %464 : vector<8x128xf32>
    %c44 = arith.constant 44 : index
    %466 = memref.load %arg1[%c44] : memref<131xf32, #tpu.memory_space<smem>>
    %467 = vector.broadcast %466 : f32 to vector<8x128xf32>
    %468 = arith.addf %465, %467 : vector<8x128xf32>
    %cst_36 = arith.constant 0.000000e+00 : f32
    %469 = vector.broadcast %cst_36 : f32 to vector<8x128xf32>
    %470 = arith.maximumf %468, %469 : vector<8x128xf32>
    %c60 = arith.constant 60 : index
    %471 = memref.load %arg1[%c60] : memref<131xf32, #tpu.memory_space<smem>>
    %472 = vector.broadcast %471 : f32 to vector<8x128xf32>
    %473 = arith.mulf %470, %472 : vector<8x128xf32>
    %474 = arith.addf %458, %473 : vector<8x128xf32>
    %c13 = arith.constant 13 : index
    %475 = memref.load %arg1[%c13] : memref<131xf32, #tpu.memory_space<smem>>
    %476 = vector.broadcast %475 : f32 to vector<8x128xf32>
    %477 = arith.mulf %0, %476 : vector<8x128xf32>
    %c29 = arith.constant 29 : index
    %478 = memref.load %arg1[%c29] : memref<131xf32, #tpu.memory_space<smem>>
    %479 = vector.broadcast %478 : f32 to vector<8x128xf32>
    %480 = arith.mulf %1, %479 : vector<8x128xf32>
    %481 = arith.addf %477, %480 : vector<8x128xf32>
    %c45 = arith.constant 45 : index
    %482 = memref.load %arg1[%c45] : memref<131xf32, #tpu.memory_space<smem>>
    %483 = vector.broadcast %482 : f32 to vector<8x128xf32>
    %484 = arith.addf %481, %483 : vector<8x128xf32>
    %cst_37 = arith.constant 0.000000e+00 : f32
    %485 = vector.broadcast %cst_37 : f32 to vector<8x128xf32>
    %486 = arith.maximumf %484, %485 : vector<8x128xf32>
    %c61 = arith.constant 61 : index
    %487 = memref.load %arg1[%c61] : memref<131xf32, #tpu.memory_space<smem>>
    %488 = vector.broadcast %487 : f32 to vector<8x128xf32>
    %489 = arith.mulf %486, %488 : vector<8x128xf32>
    %490 = arith.addf %474, %489 : vector<8x128xf32>
    %c14 = arith.constant 14 : index
    %491 = memref.load %arg1[%c14] : memref<131xf32, #tpu.memory_space<smem>>
    %492 = vector.broadcast %491 : f32 to vector<8x128xf32>
    %493 = arith.mulf %0, %492 : vector<8x128xf32>
    %c30 = arith.constant 30 : index
    %494 = memref.load %arg1[%c30] : memref<131xf32, #tpu.memory_space<smem>>
    %495 = vector.broadcast %494 : f32 to vector<8x128xf32>
    %496 = arith.mulf %1, %495 : vector<8x128xf32>
    %497 = arith.addf %493, %496 : vector<8x128xf32>
    %c46 = arith.constant 46 : index
    %498 = memref.load %arg1[%c46] : memref<131xf32, #tpu.memory_space<smem>>
    %499 = vector.broadcast %498 : f32 to vector<8x128xf32>
    %500 = arith.addf %497, %499 : vector<8x128xf32>
    %cst_38 = arith.constant 0.000000e+00 : f32
    %501 = vector.broadcast %cst_38 : f32 to vector<8x128xf32>
    %502 = arith.maximumf %500, %501 : vector<8x128xf32>
    %c62 = arith.constant 62 : index
    %503 = memref.load %arg1[%c62] : memref<131xf32, #tpu.memory_space<smem>>
    %504 = vector.broadcast %503 : f32 to vector<8x128xf32>
    %505 = arith.mulf %502, %504 : vector<8x128xf32>
    %506 = arith.addf %490, %505 : vector<8x128xf32>
    %c15 = arith.constant 15 : index
    %507 = memref.load %arg1[%c15] : memref<131xf32, #tpu.memory_space<smem>>
    %508 = vector.broadcast %507 : f32 to vector<8x128xf32>
    %509 = arith.mulf %0, %508 : vector<8x128xf32>
    %c31 = arith.constant 31 : index
    %510 = memref.load %arg1[%c31] : memref<131xf32, #tpu.memory_space<smem>>
    %511 = vector.broadcast %510 : f32 to vector<8x128xf32>
    %512 = arith.mulf %1, %511 : vector<8x128xf32>
    %513 = arith.addf %509, %512 : vector<8x128xf32>
    %c47 = arith.constant 47 : index
    %514 = memref.load %arg1[%c47] : memref<131xf32, #tpu.memory_space<smem>>
    %515 = vector.broadcast %514 : f32 to vector<8x128xf32>
    %516 = arith.addf %513, %515 : vector<8x128xf32>
    %cst_39 = arith.constant 0.000000e+00 : f32
    %517 = vector.broadcast %cst_39 : f32 to vector<8x128xf32>
    %518 = arith.maximumf %516, %517 : vector<8x128xf32>
    %c63 = arith.constant 63 : index
    %519 = memref.load %arg1[%c63] : memref<131xf32, #tpu.memory_space<smem>>
    %520 = vector.broadcast %519 : f32 to vector<8x128xf32>
    %521 = arith.mulf %518, %520 : vector<8x128xf32>
    %522 = arith.addf %506, %521 : vector<8x128xf32>
    %c64 = arith.constant 64 : index
    %523 = memref.load %arg1[%c64] : memref<131xf32, #tpu.memory_space<smem>>
    %524 = vector.broadcast %523 : f32 to vector<8x128xf32>
    %525 = arith.addf %522, %524 : vector<8x128xf32>
    %c0_40 = arith.constant 0 : index
    %c0_41 = arith.constant 0 : index
    %526 = vector.load %arg4[%c0_40, %c0_41] : memref<8x128xf32, #tpu.memory_space<vmem>>, vector<8x128xf32>
    %cst_42 = arith.constant 1.000000e-10 : f32
    %527 = vector.broadcast %cst_42 : f32 to vector<8x128xf32>
    %528 = arith.addf %526, %527 : vector<8x128xf32>
    %529 = math.log %528 : vector<8x128xf32>
    %cst_43 = arith.constant 0.000000e+00 : f32
    %530 = vector.broadcast %cst_43 : f32 to vector<8x128xf32>
    %531 = arith.subf %530, %529 : vector<8x128xf32>
    %cst_44 = arith.constant 1.000000e-10 : f32
    %532 = vector.broadcast %cst_44 : f32 to vector<8x128xf32>
    %533 = arith.addf %531, %532 : vector<8x128xf32>
    %534 = math.log %533 : vector<8x128xf32>
    %cst_45 = arith.constant 0.000000e+00 : f32
    %535 = vector.broadcast %cst_45 : f32 to vector<8x128xf32>
    %536 = arith.subf %535, %534 : vector<8x128xf32>
    %537 = arith.addf %525, %536 : vector<8x128xf32>
    %c130 = arith.constant 130 : index
    %538 = memref.load %arg1[%c130] : memref<131xf32, #tpu.memory_space<smem>>
    %539 = vector.broadcast %538 : f32 to vector<8x128xf32>
    %540 = arith.mulf %537, %539 : vector<8x128xf32>
    %541 = math.tanh %540 : vector<8x128xf32>
    %cst_46 = arith.constant 5.000000e-01 : f32
    %542 = vector.broadcast %cst_46 : f32 to vector<8x128xf32>
    %543 = arith.mulf %542, %541 : vector<8x128xf32>
    %cst_47 = arith.constant 5.000000e-01 : f32
    %544 = vector.broadcast %cst_47 : f32 to vector<8x128xf32>
    %545 = arith.addf %544, %543 : vector<8x128xf32>
    %c0_48 = arith.constant 0 : index
    %c0_49 = arith.constant 0 : index
    %546 = vector.load %arg6[%c0_48, %c0_49] : memref<8x128xf32, #tpu.memory_space<vmem>>, vector<8x128xf32>
    tpu.vector_store %arg6[%c0_48, %c0_49], %545 {strides = array<i32>} : memref<8x128xf32, #tpu.memory_space<vmem>>, vector<8x128xf32>,
    return
  }
  func.func @transform_0(%arg0: i32, %arg1: memref<131xf32, #tpu.memory_space<smem>>) -> (i32, i32) {
    %c0_i32 = arith.constant 0 : i32
    %c0_i32_0 = arith.constant 0 : i32
    return %arg0, %c0_i32 : i32, i32
  }
  func.func @transform_1(%arg0: i32, %arg1: memref<131xf32, #tpu.memory_space<smem>>) -> (i32, i32) {
    %c0_i32 = arith.constant 0 : i32
    %c0_i32_0 = arith.constant 0 : i32
    return %arg0, %c0_i32 : i32, i32
  }
  func.func @transform_2(%arg0: i32, %arg1: memref<131xf32, #tpu.memory_space<smem>>) -> (i32, i32) {
    %c0_i32 = arith.constant 0 : i32
    %c0_i32_0 = arith.constant 0 : i32
    return %arg0, %c0_i32 : i32, i32
  }
  func.func @transform_3(%arg0: i32, %arg1: memref<131xf32, #tpu.memory_space<smem>>) -> (i32, i32) {
    %c0_i32 = arith.constant 0 : i32
    %c0_i32_0 = arith.constant 0 : i32
    return %arg0, %c0_i32 : i32, i32
  }
  func.func @transform_4(%arg0: i32, %arg1: memref<131xf32, #tpu.memory_space<smem>>) -> (i32, i32) {
    %c0_i32 = arith.constant 0 : i32
    %c0_i32_0 = arith.constant 0 : i32
    return %arg0, %c0_i32 : i32, i32
  }
}

</mosaic_0001>

<bundles_post_ra>
// kernel: tpu_custom_call.1
= control target key start
LH: loop header
LB: loop body
LE: loop exit
PB: predicated region body
PF: predicated region fallthrough
CT: control target
= control target key end

     0   :  { %s1387_s0 = inlined_call_operand.hbm [shape: f32[131], index: 0, kind: input, shape index: {}]   ;;  %s1388_s1 = inlined_call_operand.hbm [shape: f32[8,128], index: 1, kind: input, shape index: {}]   ;;  %s1389_s2 = inlined_call_operand.hbm [shape: f32[8,128], index: 2, kind: input, shape index: {}]   ;;  %s1390_s3 = inlined_call_operand.vmem [shape: f32[8,128], index: 3, kind: input, shape index: {}]   ;;  %s1391_s4 = inlined_call_operand.hbm [shape: f32[8,128], index: 4, kind: output, shape index: {0}]   ;;  %s1392_s5 = inlined_call_operand.hbm [shape: f32[8,128], index: 5, kind: output, shape index: {1}]  }
   0x1   :  { %s728_s20 = scalar_lea.hbm %s1387_s0, 32 }
   0x2   :  { %p729_p0 = scmp.ne.s32.totalorder %s1387_s0, %s728_s20  ;;  %p732_p1 = scmp.lt.u32.totalorder %s728_s20, %s1387_s0 }
   0x4   :  { %p734_p2 = pnand %p732_p1, %p729_p0 }
   0x6   :  { %737 = shalt.err (!%p734_p2)  }
   0x7   :  { %s836_s25 = smov [#allocation3]  }
   0x8   :  { %12 = dma.hbm_to_smem %s1387_s0, 32, %s836_s25, [#allocation2] }
   0x9   :  { %826 = dma.done.wait [#allocation2], 32 }
   0xa   :  { %827 = vsyncadd [#allocation2], 4294967264 }
   0xb   :  { %14 = sfence }
   0xc   :  { %15 = vsyncpa [#allocation5], 0 }
   0xd   :  { %16 = vsyncpa [#allocation8], 0 }
   0xe   :  { %17 = vsyncpa [#allocation6], 0 }
   0xf   :  { %18 = vsyncpa [#allocation11], 0  ;;  %s837_s28 = smov [#allocation4]   ;;  %s838_s30 = smov [#allocation7]  }
  0x10   :  { %s25_s29 = sshll.u32 %s837_s28, 4  ;;  %s35_s6 = sshll.u32 %s838_s30, 4  ;;  %s26_s29 = int_to_ptr.vmem [resolvable:$true] %s25_s29  ;;  %s36_s6 = int_to_ptr.vmem [resolvable:$true] %s35_s6 }
  0x11   :  { %s738_s9 = scalar_lea.hbm %s1388_s1, 128 }
  0x12   :  { %p739_p3 = scmp.ne.s32.totalorder %s1388_s1, %s738_s9  ;;  %p742_p4 = scmp.lt.u32.totalorder %s738_s9, %s1388_s1 }
  0x14   :  { %p744_p5 = pnand %p742_p4, %p739_p3 }
  0x16   :  { %747 = shalt.err (!%p744_p5)
}
  0x17   :  { %s748_s13 = scalar_lea.vmem %s26_s29, 128  ;;  %p753_p7 = scmp.lt.s32.totalorder %s26_s29, %s26_s29 }
  0x18   :  { %p749_p6 = scmp.ne.s32.totalorder %s26_s29, %s748_s13  ;;  %p754_p8 = scmp.lt.s32.totalorder %s748_s13, %s748_s13 }
  0x1a   :  { %p755_p9 = por %p754_p8, %p753_p7 }
  0x1c   :  { %p756_p10 = pnand %p755_p9, %p749_p6 }
  0x1e   :  { %759 = shalt.err (!%p756_p10)
}
  0x1f   :  { %28 = dma.hbm_to_vmem [thread:$0]  %s1388_s1, 128, %s26_s29, [#allocation5]  }
  0x20   :  { %s760_s18 = scalar_lea.hbm %s1389_s2, 128 }
  0x21   :  { %p761_p11 = scmp.ne.s32.totalorder %s1389_s2, %s760_s18  ;;  %p764_p12 = scmp.lt.u32.totalorder %s760_s18, %s1389_s2 }
  0x23   :  { %p766_p13 = pnand %p764_p12, %p761_p11 }
  0x25   :  { %769 = shalt.err (!%p766_p13)
}
  0x26   :  { %s770_s23 = scalar_lea.vmem %s36_s6, 128  ;;  %p775_p1 = scmp.lt.s32.totalorder %s36_s6, %s36_s6 }
  0x27   :  { %p771_p0 = scmp.ne.s32.totalorder %s36_s6, %s770_s23  ;;  %p776_p2 = scmp.lt.s32.totalorder %s770_s23, %s770_s23 }
  0x29   :  { %p777_p3 = por %p776_p2, %p775_p1 }
  0x2b   :  { %p778_p4 = pnand %p777_p3, %p771_p0 }
  0x2d   :  { %781 = shalt.err (!%p778_p4)
}
  0x2e   :  { %38 = dma.hbm_to_vmem [thread:$0]  %s1389_s2, 128, %s36_s6, [#allocation8]  }
  0x2f   :  { %828 = dma.done.wait [#allocation5], 128  }
  0x30   :  { %829 = vsyncadd [#allocation5], 4294967168 }
  0x31   :  { %830 = dma.done.wait [#allocation8], 128  }
  0x32   :  { %831 = vsyncadd [#allocation8], 4294967168  ;;  %s585_s25 = sld [smem:[#allocation3 + $0x41]]  ;;  %s589_s29 = sld [smem:[#allocation3 + $0x42]]  ;;  %v923_v0 = vld [vmem:[#allocation4] sm:$0xff]  ;;  %v925_v1 = vld [vmem:[#allocation7] sm:$0xff] }
  0x33   :  { %s586_s26 = sld [smem:[#allocation3 + $0x51]]  ;;  %s590_s30 = sld [smem:[#allocation3 + $0x52]]  ;;  %v538_v6 = vld [vmem:[%s1390_s3] sm:$0xff] }
  0x34   :  { %s907_s27 = sld [smem:[#allocation3 + $0x61]]  ;;  %s911_s7 = sld [smem:[#allocation3 + $0x62]]  ;;  %v959_v17 = vadd.f32 1e-10, %v538_v6 }
  0x35   :  { %s909_s28 = sld [smem:[#allocation3 + $0x71]]  ;;  %s913_s8 = sld [smem:[#allocation3 + $0x72]] }
  0x36   :  { %s915_s9 = sld [smem:[#allocation3 + $0x43]]  ;;  %s927_s11 = sld [smem:[#allocation3 + $0x44]] }
  0x37   :  { %s917_s2 = sld [smem:[#allocation3 + $0x53]]  ;;  %s929_s0 = sld [smem:[#allocation3 + $0x54]] }
  0x38   :  { %s919_s6 = sld [smem:[#allocation3 + $0x63]]  ;;  %v50_v2 = vstv %s585_s25  ;;  %s933_s12 = sld [smem:[#allocation3 + $0x64]]  ;;  %v65_v8 = vstv %s589_s29 }
  0x39   :  { %s921_s10 = sld [smem:[#allocation3 + $0x73]]  ;;  %v53_v3 = vstv %s586_s26  ;;  %v51_v4 = vmul.f32 %v50_v2, %v923_v0  ;;  %s935_s13 = sld [smem:[#allocation3 + $0x74]]  ;;  %v68_v9 = vstv %s590_s30  ;;  %v66_v12 = vmul.f32 %v65_v8, %v923_v0 }
  0x3a   :  { %v54_v5 = vmul.f32 %v53_v3, %v925_v1  ;;  %v57_v7 = vstv %s907_s27  ;;  %s941_s16 = sld [smem:[#allocation3 + $0x45]]  ;;  %v69_v13 = vmul.f32 %v68_v9, %v925_v1  ;;  %v72_v14 = vstv %s911_s7  ;;  %s955_s19 = sld [smem:[#allocation3 + $0x46]] }
  0x3b   :  { %s943_s17 = sld [smem:[#allocation3 + $0x55]]  ;;  %v61_v11 = vstv %s909_s28  ;;  %s957_s20 = sld [smem:[#allocation3 + $0x56]]  ;;  %v76_v22 = vstv %s913_s8 }
  0x3c   :  { %v55_v10 = vadd.f32 %v54_v5, %v51_v4  ;;  %s948_s18 = sld [smem:[#allocation3 + $0x65]]  ;;  %v80_v15 = vstv %s915_s9  ;;  %v70_v19 = vadd.f32 %v69_v13, %v66_v12  ;;  %s963_s21 = sld [smem:[#allocation3 + $0x66]]  ;;  %v95_v24 = vstv %s927_s11 }
  0x3d   :  { %s950_s3 = sld [smem:[#allocation3 + $0x75]]  ;;  %v83_v16 = vstv %s917_s2  ;;  %v81_v20 = vmul.f32 %v80_v15, %v923_v0  ;;  %v98_v25 = vstv %s929_s0  ;;  %s969_s22 = sld [smem:[#allocation3 + $0x47]]  ;;  %v96_v29 = vmul.f32 %v95_v24, %v923_v0 }
  0x3e   :  { %v58_v18 = vadd.f32 %v57_v7, %v55_v10  ;;  %v84_v21 = vmul.f32 %v83_v16, %v925_v1  ;;  %v87_v23 = vstv %s919_s6  ;;  %s971_s23 = sld [smem:[#allocation3 + $0x57]]  ;;  %v73_v27 = vadd.f32 %v72_v14, %v70_v19  ;;  %s978_s1 = sld [smem:[#allocation3 + $0x76]] }
  0x3f   :  { %v91_v30 = vstv %s921_s10  ;;  %v99_v31 = vmul.f32 %v98_v25, %v925_v1  ;;  %v102_v32 = vstv %s933_s12  ;;  %s980_s24 = sld [smem:[#allocation3 + $0x67]]  ;;  %s983_s25 = sld [smem:[#allocation3 + $0x48]]  ;;  %v106_v39 = vstv %s935_s13 }
  0x40   :  { %v59_v26 = vmax.f32 %v58_v18, 0.0  ;;  %v85_v28 = vadd.f32 %v84_v21, %v81_v20  ;;  %v110_v33 = vstv %s941_s16  ;;  %v74_v35 = vmax.f32 %v73_v27, 0.0  ;;  %s985_s26 = sld [smem:[#allocation3 + $0x58]]  ;;  %s992_s27 = sld [smem:[#allocation3 + $0x77]] }
  0x41   :  { %v111_v37 = vmul.f32 %v110_v33, %v923_v0  ;;  %v100_v38 = vadd.f32 %v99_v31, %v96_v29  ;;  %v113_v40 = vstv %s943_s17  ;;  %v125_v45 = vstv %s955_s19  ;;  %s994_s28 = sld [smem:[#allocation3 + $0x68]]  ;;  %s999_s29 = sld [smem:[#allocation3 + $0x49]] }
  0x42   :  { %v62_v34 = vmul.f32 %v61_v11, %v59_v26  ;;  %v88_v36 = vadd.f32 %v87_v23, %v85_v28  ;;  %v117_v41 = vstv %s948_s18  ;;  %v77_v42 = vmul.f32 %v76_v22, %v74_v35  ;;  %s1001_s30 = sld [smem:[#allocation3 + $0x59]]  ;;  %s1007_s7 = sld [smem:[#allocation3 + $0x78]] }
  0x43   :  { %v114_v44 = vmul.f32 %v113_v40, %v925_v1  ;;  %v103_v46 = vadd.f32 %v102_v32, %v100_v38  ;;  %v121_v47 = vstv %s950_s3  ;;  %v126_v48 = vmul.f32 %v125_v45, %v923_v0  ;;  %s1009_s8 = sld [smem:[#allocation3 + $0x69]]  ;;  %s1012_s9 = sld [smem:[#allocation3 + $0x4a]] }
  0x44   :  { %v89_v43 = vmax.f32 %v88_v36, 0.0  ;;  %v128_v49 = vstv %s957_s20  ;;  %v78_v50 = vadd.f32 %v77_v42, %v62_v34  ;;  %v132_v55 = vstv %s963_s21  ;;  %s1014_s2 = sld [smem:[#allocation3 + $0x5a]]  ;;  %s1019_s6 = sld [smem:[#allocation3 + $0x79]] }
  0x45   :  { %v115_v52 = vadd.f32 %v114_v44, %v111_v37  ;;  %v129_v53 = vmul.f32 %v128_v49, %v925_v1  ;;  %v104_v54 = vmax.f32 %v103_v46, 0.0  ;;  %v140_v56 = vstv %s969_s22  ;;  %s1023_s10 = sld [smem:[#allocation3 + $0x6a]]  ;;  %s1025_s11 = sld [smem:[#allocation3 + $0x4b]] }
  0x46   :  { %v92_v51 = vmul.f32 %v91_v30, %v89_v43  ;;  %v143_v57 = vstv %s971_s23  ;;  %v141_v61 = vmul.f32 %v140_v56, %v923_v0  ;;  %v136_v63 = vstv %s978_s1  ;;  %s1029_s0 = sld [smem:[#allocation3 + $0x7a]]  ;;  %s1033_s12 = sld [smem:[#allocation3 + $0x5b]] }
  0x47   :  { %v118_v59 = vadd.f32 %v117_v41, %v115_v52  ;;  %v130_v60 = vadd.f32 %v129_v53, %v126_v48  ;;  %v107_v62 = vmul.f32 %v106_v39, %v104_v54  ;;  %v144_v2 = vmul.f32 %v143_v57, %v925_v1  ;;  %s1035_s13 = sld [smem:[#allocation3 + $0x6b]]  ;;  %s1039_s14 = sld [smem:[#allocation3 + $0x4c]] }
  0x48   :  { %v93_v58 = vadd.f32 %v92_v51, %v78_v50  ;;  %v147_v3 = vstv %s980_s24  ;;  %v155_v6 = vstv %s983_s25  ;;  %v158_v7 = vstv %s985_s26  ;;  %s1043_s15 = sld [smem:[#allocation3 + $0x7b]]  ;;  %s1045_s16 = sld [smem:[#allocation3 + $0x5c]] }
  0x49   :  { %v119_v4 = vmax.f32 %v118_v59, 0.0  ;;  %v133_v5 = vadd.f32 %v132_v55, %v130_v60  ;;  %v145_v9 = vadd.f32 %v144_v2, %v141_v61  ;;  %v156_v10 = vmul.f32 %v155_v6, %v923_v0  ;;  %s1049_s17 = sld [smem:[#allocation3 + $0x6c]]  ;;  %s1055_s3 = sld [smem:[#allocation3 + $0x4d]] }
  0x4a   :  { %v108_v8 = vadd.f32 %v107_v62, %v93_v58  ;;  %v159_v11 = vmul.f32 %v158_v7, %v925_v1  ;;  %v151_v14 = vstv %s992_s27  ;;  %v162_v15 = vstv %s994_s28  ;;  %s1051_s18 = sld [smem:[#allocation3 + $0x7c]]  ;;  %s1057_s19 = sld [smem:[#allocation3 + $0x5d]] }
  0x4b   :  { %v122_v12 = vmul.f32 %v121_v47, %v119_v4  ;;  %v134_v13 = vmax.f32 %v133_v5, 0.0  ;;  %v148_v16 = vadd.f32 %v147_v3, %v145_v9  ;;  %v170_v19 = vstv %s999_s29  ;;  %s1061_s20 = sld [smem:[#allocation3 + $0x6d]]  ;;  %s1066_s21 = sld [smem:[#allocation3 + $0x4e]] }
  0x4c   :  { %v160_v18 = vadd.f32 %v159_v11, %v156_v10  ;;  %v173_v20 = vstv %s1001_s30  ;;  %v171_v23 = vmul.f32 %v170_v19, %v923_v0  ;;  %v166_v27 = vstv %s1007_s7  ;;  %s1068_s22 = sld [smem:[#allocation3 + $0x5e]]  ;;  %s1074_s23 = sld [smem:[#allocation3 + $0x7d]] }
  0x4d   :  { %v123_v21 = vadd.f32 %v122_v12, %v108_v8  ;;  %v137_v22 = vmul.f32 %v136_v63, %v134_v13  ;;  %v174_v24 = vmul.f32 %v173_v20, %v925_v1  ;;  %v149_v25 = vmax.f32 %v148_v16, 0.0  ;;  %s1076_s1 = sld [smem:[#allocation3 + $0x6e]]  ;;  %s1080_s24 = sld [smem:[#allocation3 + $0x4f]] }
  0x4e   :  { %v163_v26 = vadd.f32 %v162_v15, %v160_v18  ;;  %v177_v28 = vstv %s1009_s8  ;;  %v185_v31 = vstv %s1012_s9  ;;  %v188_v32 = vstv %s1014_s2  ;;  %s1082_s25 = sld [smem:[#allocation3 + $0x5f]]  ;;  %s1089_s26 = sld [smem:[#allocation3 + $0x7e]] }
  0x4f   :  { %v138_v29 = vadd.f32 %v137_v22, %v123_v21  ;;  %v175_v30 = vadd.f32 %v174_v24, %v171_v23  ;;  %v152_v33 = vmul.f32 %v151_v14, %v149_v25  ;;  %v186_v35 = vmul.f32 %v185_v31, %v923_v0  ;;  %s1091_s27 = sld [smem:[#allocation3 + $0x6f]]  ;;  %s1096_s28 = sld [smem:[#allocation3 + $0x50]] }
  0x50   :  { %v164_v34 = vmax.f32 %v163_v26, 0.0  ;;  %v189_v36 = vmul.f32 %v188_v32, %v925_v1  ;;  %v181_v38 = vstv %s1019_s6  ;;  %v192_v39 = vstv %s1023_s10  ;;  %s1099_s29 = sld [smem:[#allocation3 + $0x7f]]  ;;  %s1101_s30 = sld [smem:[#allocation3 + $0x60]] }
  0x51   :  { %v178_v37 = vadd.f32 %v177_v28, %v175_v30  ;;  %v200_v40 = vstv %s1025_s11  ;;  %v153_v41 = vadd.f32 %v152_v33, %v138_v29  ;;  %v196_v46 = vstv %s1029_s0  ;;  %s1107_s7 = sld [smem:[#allocation3 + $0x70]]  ;;  %s1121_s6 = sld [smem:[#allocation3 + $0x81]] }
  0x52   :  { %v167_v42 = vmul.f32 %v166_v27, %v164_v34  ;;  %v190_v43 = vadd.f32 %v189_v36, %v186_v35  ;;  %v201_v44 = vmul.f32 %v200_v40, %v923_v0  ;;  %v203_v47 = vstv %s1033_s12  ;;  %s1109_s8 = sld [smem:[#allocation3 + $0x80]]  ;;  %s1127_s11 = sld [smem:[#allocation3 + $0x1]] }
  0x53   :  { %v179_v45 = vmax.f32 %v178_v37, 0.0  ;;  %v207_v48 = vstv %s1035_s13  ;;  %v204_v51 = vmul.f32 %v203_v47, %v925_v1  ;;  %v215_v52 = vstv %s1039_s14  ;;  %s1112_s9 = sld [smem:[#allocation3]]  ;;  %s1133_s12 = sld [smem:[#allocation3 + $0x11]] }
  0x54   :  { %v168_v49 = vadd.f32 %v167_v42, %v153_v41  ;;  %v193_v50 = vadd.f32 %v192_v39, %v190_v43  ;;  %v211_v54 = vstv %s1043_s15  ;;  %v216_v55 = vmul.f32 %v215_v52, %v923_v0  ;;  %s1114_s2 = sld [smem:[#allocation3 + $0x10]]  ;;  %s1136_s13 = sld [smem:[#allocation3 + $0x21]] }
  0x55   :  { %v182_v53 = vmul.f32 %v181_v38, %v179_v45  ;;  %v218_v56 = vstv %s1045_s16  ;;  %v205_v58 = vadd.f32 %v204_v51, %v201_v44  ;;  %v222_v60 = vstv %s1049_s17  ;;  %s1123_s10 = sld [smem:[#allocation3 + $0x20]]  ;;  %s1138_s14 = sld [smem:[#allocation3 + $0x31]] }
  0x56   :  { %v194_v57 = vmax.f32 %v193_v50, 0.0  ;;  %v219_v59 = vmul.f32 %v218_v56, %v925_v1  ;;  %v226_v62 = vstv %s1051_s18  ;;  %v230_v63 = vstv %s1055_s3  ;;  %s1131_s0 = sld [smem:[#allocation3 + $0x30]]  ;;  %s1143_s15 = sld [smem:[#allocation3 + $0x2]] }
  0x57   :  { %v183_v61 = vadd.f32 %v182_v53, %v168_v49  ;;  %v233_v2 = vstv %s1057_s19  ;;  %v208_v4 = vadd.f32 %v207_v48, %v205_v58  ;;  %v231_v6 = vmul.f32 %v230_v63, %v923_v0  ;;  %s1145_s16 = sld [smem:[#allocation3 + $0x12]]  ;;  %s1154_s18 = sld [smem:[#allocation3 + $0x3]] }
  0x58   :  { %v197_v3 = vmul.f32 %v196_v46, %v194_v57  ;;  %v220_v5 = vadd.f32 %v219_v59, %v216_v55  ;;  %v234_v7 = vmul.f32 %v233_v2, %v925_v1  ;;  %v237_v8 = vstv %s1061_s20  ;;  %s1148_s17 = sld [smem:[#allocation3 + $0x22]]  ;;  %s1156_s3 = sld [smem:[#allocation3 + $0x13]] }
  0x59   :  { %v245_v9 = vstv %s1066_s21  ;;  %v248_v10 = vstv %s1068_s22  ;;  %v209_v12 = vmax.f32 %v208_v4, 0.0  ;;  %v241_v16 = vstv %s1074_s23  ;;  %s1162_s19 = sld [smem:[#allocation3 + $0x32]]  ;;  %s1164_s20 = sld [smem:[#allocation3 + $0x23]] }
  0x5a   :  { %v198_v11 = vadd.f32 %v197_v3, %v183_v61  ;;  %v223_v13 = vadd.f32 %v222_v60, %v220_v5  ;;  %v246_v14 = vmul.f32 %v245_v9, %v923_v0  ;;  %v235_v15 = vadd.f32 %v234_v7, %v231_v6  ;;  %s1167_s21 = sld [smem:[#allocation3 + $0x4]]  ;;  %s1172_s22 = sld [smem:[#allocation3 + $0x33]] }
  0x5b   :  { %v249_v18 = vmul.f32 %v248_v10, %v925_v1  ;;  %v252_v19 = vstv %s1076_s1  ;;  %v212_v20 = vmul.f32 %v211_v54, %v209_v12  ;;  %v260_v22 = vstv %s1080_s24  ;;  %s1174_s23 = sld [smem:[#allocation3 + $0x14]]  ;;  %s1183_s24 = sld [smem:[#allocation3 + $0x5]] }
  0x5c   :  { %v224_v21 = vmax.f32 %v223_v13, 0.0  ;;  %v263_v23 = vstv %s1082_s25  ;;  %v238_v24 = vadd.f32 %v237_v8, %v235_v15  ;;  %v261_v26 = vmul.f32 %v260_v22, %v923_v0  ;;  %s1178_s1 = sld [smem:[#allocation3 + $0x24]]  ;;  %s1185_s25 = sld [smem:[#allocation3 + $0x15]] }
  0x5d   :  { %v250_v25 = vadd.f32 %v249_v18, %v246_v14  ;;  %v264_v27 = vmul.f32 %v263_v23, %v925_v1  ;;  %v213_v28 = vadd.f32 %v212_v20, %v198_v11  ;;  %v256_v30 = vstv %s1089_s26  ;;  %s1192_s26 = sld [smem:[#allocation3 + $0x34]] }
  0x5e   :  { %v227_v29 = vmul.f32 %v226_v62, %v224_v21  ;;  %v267_v31 = vstv %s1091_s27  ;;  %v239_v32 = vmax.f32 %v238_v24, 0.0  ;;  %v275_v35 = vstv %s1096_s28  ;;  %s1194_s27 = sld [smem:[#allocation3 + $0x25]]  ;;  %s1197_s28 = sld [smem:[#allocation3 + $0x6]] }
  0x5f   :  { %v253_v33 = vadd.f32 %v252_v19, %v250_v25  ;;  %v265_v34 = vadd.f32 %v264_v27, %v261_v26  ;;  %v271_v37 = vstv %s1099_s29  ;;  %v276_v38 = vmul.f32 %v275_v35, %v923_v0  ;;  %s1199_s29 = sld [smem:[#allocation3 + $0x16]] }
  0x60   :  { %v228_v36 = vadd.f32 %v227_v29, %v213_v28  ;;  %v278_v39 = vstv %s1101_s30  ;;  %v242_v40 = vmul.f32 %v241_v16, %v239_v32  ;;  %v282_v44 = vstv %s1107_s7  ;;  %s1205_s30 = sld [smem:[#allocation3 + $0x26]]  ;;  %s1207_s7 = sld [smem:[#allocation3 + $0x7]] }
  0x61   :  { %v254_v41 = vmax.f32 %v253_v33, 0.0  ;;  %v268_v42 = vadd.f32 %v267_v31, %v265_v34  ;;  %v279_v43 = vmul.f32 %v278_v39, %v925_v1  ;;  %v286_v45 = vstv %s1109_s8  ;;  %s1212_s8 = sld [smem:[#allocation3 + $0x35]] }
  0x62   :  { %v296_v46 = vstv %s1112_s9  ;;  %v299_v47 = vstv %s1114_s2  ;;  %v243_v48 = vadd.f32 %v242_v40, %v228_v36  ;;  %v290_v52 = vstv %s1121_s6  ;;  %s1215_s9 = sld [smem:[#allocation3 + $0x36]]  ;;  %s1217_s2 = sld [smem:[#allocation3 + $0x17]] }
  0x63   :  { %v257_v49 = vmul.f32 %v256_v30, %v254_v41  ;;  %v269_v50 = vmax.f32 %v268_v42, 0.0  ;;  %v280_v51 = vadd.f32 %v279_v43, %v276_v38  ;;  %v297_v53 = vmul.f32 %v296_v46, %v923_v0  ;;  %s1222_s6 = sld [smem:[#allocation3 + $0x8]] }
  0x64   :  { %v300_v54 = vmul.f32 %v299_v47, %v925_v1  ;;  %v303_v55 = vstv %s1123_s10  ;;  %v311_v59 = vstv %s1127_s11  ;;  %v307_v61 = vstv %s1131_s0  ;;  %s1225_s10 = sld [smem:[#allocation3 + $0x27]]  ;;  %s1227_s11 = sld [smem:[#allocation3 + $0x18]] }
  0x65   :  { %v258_v56 = vadd.f32 %v257_v49, %v243_v48  ;;  %v272_v57 = vmul.f32 %v271_v37, %v269_v50  ;;  %v283_v58 = vadd.f32 %v282_v44, %v280_v51  ;;  %v312_v62 = vmul.f32 %v311_v59, %v923_v0  ;;  %s1232_s0 = sld [smem:[#allocation3 + $0x28]] }
  0x66   :  { %v301_v60 = vadd.f32 %v300_v54, %v297_v53  ;;  %v314_v63 = vstv %s1133_s12  ;;  %v318_v5 = vstv %s1136_s13  ;;  %v322_v7 = vstv %s1138_s14  ;;  %s1236_s12 = sld [smem:[#allocation3 + $0x9]]  ;;  %s1244_s14 = sld [smem:[#allocation3 + $0x37]] }
  0x67   :  { %v273_v2 = vadd.f32 %v272_v57, %v258_v56  ;;  %v284_v3 = vmax.f32 %v283_v58, 0.0  ;;  %v315_v4 = vmul.f32 %v314_v63, %v925_v1  ;;  %v326_v8 = vstv %s1143_s15  ;;  %s1238_s13 = sld [smem:[#allocation3 + $0x19]] }
  0x68   :  { %v304_v6 = vadd.f32 %v303_v55, %v301_v60  ;;  %v329_v9 = vstv %s1145_s16  ;;  %v327_v12 = vmul.f32 %v326_v8, %v923_v0  ;;  %v333_v15 = vstv %s1148_s17  ;;  %s1246_s15 = sld [smem:[#allocation3 + $0x29]]  ;;  %s1250_s16 = sld [smem:[#allocation3 + $0xa]] }
  0x69   :  { %v287_v10 = vmul.f32 %v286_v45, %v284_v3  ;;  %v316_v11 = vadd.f32 %v315_v4, %v312_v62  ;;  %v330_v13 = vmul.f32 %v329_v9, %v925_v1  ;;  %v341_v16 = vstv %s1154_s18  ;;  %s1252_s17 = sld [smem:[#allocation3 + $0x1a]]  ;;  %s1257_s18 = sld [smem:[#allocation3 + $0x38]] }
  0x6a   :  { %v305_v14 = vmax.f32 %v304_v6, 0.0  ;;  %v344_v18 = vstv %s1156_s3  ;;  %v342_v22 = vmul.f32 %v341_v16, %v923_v0  ;;  %v337_v24 = vstv %s1162_s19  ;;  %s839_s3 = smov [#allocation9]  }
  0x6b   :  { %v288_v19 = vadd.f32 %v287_v10, %v273_v2  ;;  %v319_v20 = vadd.f32 %v318_v5, %v316_v11  ;;  %v331_v21 = vadd.f32 %v330_v13, %v327_v12  ;;  %v345_v25 = vmul.f32 %v344_v18, %v925_v1  ;;  %s561_s19 = sshll.u32 %s839_s3, 4  ;;  %s1274_s19 = int_to_ptr.vmem [resolvable:$true] %s561_s19 }
  0x6c   :  { %v308_v23 = vmul.f32 %v307_v61, %v305_v14  ;;  %v348_v26 = vstv %s1164_s20  ;;  %v356_v30 = vstv %s1167_s21  ;;  %v352_v32 = vstv %s1172_s22  ;;  %s1261_s20 = sld [smem:[#allocation3 + $0x2a]]  ;;  %s1263_s21 = sld [smem:[#allocation3 + $0xb]] }
  0x6d   :  { %v291_v27 = vadd.f32 %v290_v52, %v288_v19  ;;  %v320_v28 = vmax.f32 %v319_v20, 0.0  ;;  %v334_v29 = vadd.f32 %v333_v15, %v331_v21  ;;  %v346_v31 = vadd.f32 %v345_v25, %v342_v22  ;;  %s1268_s22 = sld [smem:[#allocation3 + $0x39]]  ;;  %p787_p6 = scmp.lt.s32.totalorder %s1274_s19, %s1274_s19 }
  0x6e   :  { %v357_v33 = vmul.f32 %v356_v30, %v923_v0  ;;  %v359_v34 = vstv %s1174_s23  ;;  %v363_v39 = vstv %s1178_s1  ;;  %v371_v40 = vstv %s1183_s24  ;;  %s1270_s23 = sld [smem:[#allocation3 + $0x3a]]  ;;  %s1272_s1 = sld [smem:[#allocation3 + $0x1b]] }
  0x6f   :  { %720 = vtanh.f32 %v291_v27  ;;  %v323_v35 = vmul.f32 %v322_v7, %v320_v28  ;;  %v335_v36 = vmax.f32 %v334_v29, 0.0  ;;  %v360_v37 = vmul.f32 %v359_v34, %v925_v1  ;;  %s1280_s24 = sld [smem:[#allocation3 + $0x2b]] }
  0x70   :  { %v349_v38 = vadd.f32 %v348_v26, %v346_v31  ;;  %v374_v41 = vstv %s1185_s25  ;;  %v372_v45 = vmul.f32 %v371_v40, %v923_v0  ;;  %v367_v47 = vstv %s1192_s26  ;;  %s1282_s25 = sld [smem:[#allocation3 + $0xc]] }
  0x71   :  { %v324_v42 = vadd.f32 %v323_v35, %v308_v23  ;;  %v338_v43 = vmul.f32 %v337_v24, %v335_v36  ;;  %v361_v44 = vadd.f32 %v360_v37, %v357_v33  ;;  %v375_v48 = vmul.f32 %v374_v41, %v925_v1  ;;  %s1285_s26 = sld [smem:[#allocation3 + $0x1c]] }
  0x72   :  { %v350_v46 = vmax.f32 %v349_v38, 0.0  ;;  %v378_v49 = vstv %s1194_s27  ;;  %v386_v52 = vstv %s1197_s28  ;;  %v389_v53 = vstv %s1199_s29  ;;  %s1287_s27 = sld [smem:[#allocation3 + $0x2c]]  ;;  %s782_s28 = scalar_lea.vmem %s1274_s19, 128 }
  0x73   :  { %v339_v50 = vadd.f32 %v338_v43, %v324_v42  ;;  %v364_v51 = vadd.f32 %v363_v39, %v361_v44  ;;  %v376_v55 = vadd.f32 %v375_v48, %v372_v45  ;;  %v387_v56 = vmul.f32 %v386_v52, %v923_v0  ;;  %p783_p5 = scmp.ne.s32.totalorder %s1274_s19, %s782_s28  ;;  %p788_p7 = scmp.lt.s32.totalorder %s782_s28, %s782_s28 }
  0x74   :  { %v353_v54 = vmul.f32 %v352_v32, %v350_v46  ;;  %v390_v57 = vmul.f32 %v389_v53, %v925_v1  ;;  %v393_v59 = vstv %s1205_s30  ;;  %v401_v60 = vstv %s1207_s7 }
  0x75   :  { %v365_v58 = vmax.f32 %v364_v51, 0.0  ;;  %722 = vlog2.f32 %v959_v17  ;;  %v379_v62 = vadd.f32 %v378_v49, %v376_v55  ;;  %v402_v2 = vmul.f32 %v401_v60, %v923_v0  ;;  %p789_p8 = por %p788_p7, %p787_p6 }
  0x76   :  { %v354_v61 = vadd.f32 %v353_v54, %v339_v50  ;;  %v391_v63 = vadd.f32 %v390_v57, %v387_v56  ;;  %v382_v4 = vstv %s1212_s8  ;;  %v397_v5 = vstv %s1215_s9 }
  0x77   :  { %v368_v3 = vmul.f32 %v367_v47, %v365_v58  ;;  %v404_v6 = vstv %s1217_s2  ;;  %v380_v17 = vmax.f32 %v379_v62, 0.0  ;;  %v416_v9 = vstv %s1222_s6  ;;  %p790_p9 = pnand %p789_p8, %p783_p5 }
  0x78   :  { %v394_v7 = vadd.f32 %v393_v59, %v391_v63  ;;  %v405_v8 = vmul.f32 %v404_v6, %v925_v1  ;;  %v408_v12 = vstv %s1225_s10  ;;  %v417_v13 = vmul.f32 %v416_v9, %v923_v0 }
  0x79   :  { %v721_v10 = vpop.eup %720  ;;  %v369_v11 = vadd.f32 %v368_v3, %v354_v61  ;;  %v419_v14 = vstv %s1227_s11  ;;  %v383_v16 = vmul.f32 %v382_v4, %v380_v17  ;;  %v423_v21 = vstv %s1232_s0 }
  0x7a   :  { %v293_v15 = vadd.f32 0.6, %v721_v10  ;;  %v395_v18 = vmax.f32 %v394_v7, 0.0  ;;  %v406_v19 = vadd.f32 %v405_v8, %v402_v2  ;;  %v420_v20 = vmul.f32 %v419_v14, %v925_v1 }
  0x7b   :  { %v431_v22 = vstv %s1236_s12  ;;  %v434_v23 = vstv %s1238_s13  ;;  %v384_v24 = vadd.f32 %v383_v16, %v369_v11  ;;  %v412_v28 = vstv %s1244_s14 }
  0x7c   :  { %294 = vst [vmem:[#allocation9] sm:$0xff] %v293_v15  ;;  %v398_v25 = vmul.f32 %v397_v5, %v395_v18  ;;  %v409_v26 = vadd.f32 %v408_v12, %v406_v19  ;;  %v432_v27 = vmul.f32 %v431_v22, %v923_v0  ;;  %v421_v29 = vadd.f32 %v420_v20, %v417_v13 }
  0x7d   :  { %v435_v30 = vmul.f32 %v434_v23, %v925_v1  ;;  %v438_v31 = vstv %s1246_s15 }
  0x7e   :  { %793 = shalt.err (!%p790_p9)
}
  0x7f   :  { %s794_s7 = scalar_lea.hbm %s1391_s4, 128 }
  0x80   :  { %p795_p10 = scmp.ne.s32.totalorder %s1391_s4, %s794_s7  ;;  %p798_p11 = scmp.lt.u32.totalorder %s794_s7, %s1391_s4 }
  0x82   :  { %p800_p12 = pnand %p798_p11, %p795_p10 }
  0x84   :  { %803 = shalt.err (!%p800_p12)
}
  0x85   :  { %564 = dma.vmem_to_hbm [thread:$0]  %s1274_s19, 128, %s1391_s4, [#allocation6]   ;;  %v399_v32 = vadd.f32 %v398_v25, %v384_v24  ;;  %v410_v33 = vmax.f32 %v409_v26, 0.0  ;;  %v446_v34 = vstv %s1250_s16  ;;  %v449_v35 = vstv %s1252_s17  ;;  %v1315_v36 = vpop.eup %722 }
  0x86   :  { %s1311_s0 = sld [smem:[#allocation3 + $0xd]]  ;;  %v424_v37 = vadd.f32 %v423_v21, %v421_v29  ;;  %v436_v38 = vadd.f32 %v435_v30, %v432_v27  ;;  %v447_v39 = vmul.f32 %v446_v34, %v923_v0  ;;  %v450_v40 = vmul.f32 %v449_v35, %v925_v1  ;;  %s1322_s4 = sld [smem:[#allocation3 + $0x3b]] }
  0x87   :  { %s1313_s12 = sld [smem:[#allocation3 + $0x1d]]  ;;  %v413_v41 = vmul.f32 %v412_v28, %v410_v33  ;;  %v427_v42 = vstv %s1257_s18  ;;  %v453_v43 = vstv %s1261_s20  ;;  %v461_v44 = vstv %s1263_s21  ;;  %s1327_s14 = sld [smem:[#allocation3 + $0xe]] }
  0x88   :  { %s1324_s13 = sld [smem:[#allocation3 + $0x2d]]  ;;  %v425_v45 = vmax.f32 %v424_v37, 0.0  ;;  %v439_v46 = vadd.f32 %v438_v31, %v436_v38  ;;  %v451_v47 = vadd.f32 %v450_v40, %v447_v39  ;;  %v462_v48 = vmul.f32 %v461_v44, %v923_v0  ;;  %s1329_s15 = sld [smem:[#allocation3 + $0x1e]] }
  0x89   :  { %v414_v49 = vadd.f32 %v413_v41, %v399_v32  ;;  %v442_v50 = vstv %s1268_s22  ;;  %v457_v51 = vstv %s1270_s23  ;;  %v464_v52 = vstv %s1272_s1  ;;  %s1334_s16 = sld [smem:[#allocation3 + $0x3c]]  ;;  %s1337_s17 = sld [smem:[#allocation3 + $0x2e]] }
  0x8a   :  { %v428_v53 = vmul.f32 %v427_v42, %v425_v45  ;;  %v440_v54 = vmax.f32 %v439_v46, 0.0  ;;  %v454_v55 = vadd.f32 %v453_v43, %v451_v47  ;;  %v465_v56 = vmul.f32 %v464_v52, %v925_v1  ;;  %s1339_s18 = sld [smem:[#allocation3 + $0xf]]  ;;  %s1345_s3 = sld [smem:[#allocation3 + $0x3d]] }
  0x8b   :  { %v468_v57 = vstv %s1280_s24  ;;  %v476_v58 = vstv %s1282_s25  ;;  %v479_v59 = vstv %s1285_s26  ;;  %v483_v60 = vstv %s1287_s27  ;;  %s1347_s19 = sld [smem:[#allocation3 + $0x1f]]  ;;  %s1361_s21 = sld [smem:[#allocation3 + $0x3e]] }
  0x8c   :  { %v429_v61 = vadd.f32 %v428_v53, %v414_v49  ;;  %v443_v62 = vmul.f32 %v442_v50, %v440_v54  ;;  %v455_v63 = vmax.f32 %v454_v55, 0.0  ;;  %v466_v2 = vadd.f32 %v465_v56, %v462_v48  ;;  %s1354_s20 = sld [smem:[#allocation3 + $0x2f]]  ;;  %s713_s23 = sld [smem:[#allocation3 + $0x40]] }
  0x8d   :  { %v477_v3 = vmul.f32 %v476_v58, %v923_v0  ;;  %v480_v4 = vmul.f32 %v479_v59, %v925_v1  ;;  %v491_v5 = vstv %s1311_s0  ;;  %v494_v6 = vstv %s1313_s12  ;;  %s712_s22 = sld [smem:[#allocation3 + $0x3f]]  ;;  %s714_s1 = sld [smem:[#allocation3 + $0x82]] }
  0x8e   :  { %v444_v17 = vadd.f32 %v443_v62, %v429_v61  ;;  %v458_v7 = vmul.f32 %v457_v51, %v455_v63  ;;  %v469_v8 = vadd.f32 %v468_v57, %v466_v2  ;;  %v492_v9 = vmul.f32 %v491_v5, %v923_v0  ;;  %s840_s24 = smov [#allocation10]  }
  0x8f   :  { %v472_v10 = vstv %s1322_s4  ;;  %v481_v11 = vadd.f32 %v480_v4, %v477_v3  ;;  %v495_v12 = vmul.f32 %v494_v6, %v925_v1  ;;  %v498_v13 = vstv %s1324_s13  ;;  %s571_s25 = sshll.u32 %s840_s24, 4  ;;  %s572_s25 = int_to_ptr.vmem [resolvable:$true] %s571_s25 }
  0x90   :  { %v459_v14 = vadd.f32 %v458_v7, %v444_v17  ;;  %v470_v15 = vmax.f32 %v469_v8, 0.0  ;;  %v506_v16 = vstv %s1327_s14  ;;  %v509_v18 = vstv %s1329_s15  ;;  %s804_s26 = scalar_lea.vmem %s572_s25, 128  ;;  %p809_p0 = scmp.lt.s32.totalorder %s572_s25, %s572_s25 }
  0x91   :  { %v484_v19 = vadd.f32 %v483_v60, %v481_v11  ;;  %v496_v20 = vadd.f32 %v495_v12, %v492_v9  ;;  %v507_v21 = vmul.f32 %v506_v16, %v923_v0  ;;  %v510_v22 = vmul.f32 %v509_v18, %v925_v1  ;;  %p805_p13 = scmp.ne.s32.totalorder %s572_s25, %s804_s26  ;;  %p810_p1 = scmp.lt.s32.totalorder %s804_s26, %s804_s26 }
  0x92   :  { %v473_v23 = vmul.f32 %v472_v10, %v470_v15  ;;  %v487_v24 = vstv %s1334_s16  ;;  %v513_v25 = vstv %s1337_s17  ;;  %v521_v26 = vstv %s1339_s18 }
  0x93   :  { %v485_v27 = vmax.f32 %v484_v19, 0.0  ;;  %v499_v28 = vadd.f32 %v498_v13, %v496_v20  ;;  %v511_v29 = vadd.f32 %v510_v22, %v507_v21  ;;  %v522_v30 = vmul.f32 %v521_v26, %v923_v0  ;;  %p811_p2 = por %p810_p1, %p809_p0 }
  0x94   :  { %v474_v31 = vadd.f32 %v473_v23, %v459_v14  ;;  %v502_v32 = vstv %s1345_s3  ;;  %v524_v33 = vstv %s1347_s19  ;;  %v528_v39 = vstv %s1354_s20 }
  0x95   :  { %v488_v34 = vmul.f32 %v487_v24, %v485_v27  ;;  %v500_v35 = vmax.f32 %v499_v28, 0.0  ;;  %v514_v37 = vadd.f32 %v513_v25, %v511_v29  ;;  %v525_v38 = vmul.f32 %v524_v33, %v925_v1  ;;  %p812_p3 = pnand %p811_p2, %p805_p13 }
  0x96   :  { %v541_v40 = vmul.f32 0.6931472, %v1315_v36  ;;  %v517_v45 = vstv %s1361_s21  ;;  %v532_v51 = vstv %s712_s22  ;;  %v536_v54 = vstv %s713_s23 }
  0x97   :  { %v489_v41 = vadd.f32 %v488_v34, %v474_v31  ;;  %v503_v42 = vmul.f32 %v502_v32, %v500_v35  ;;  %v515_v43 = vmax.f32 %v514_v37, 0.0  ;;  %v526_v44 = vadd.f32 %v525_v38, %v522_v30 }
  0x98   :  { %v542_v46 = vsub.f32 0.0, %v541_v40  ;;  %v549_v58 = vstv %s714_s1 }
  0x99   :  { %v529_v47 = vadd.f32 %v528_v39, %v526_v44  ;;  %v504_v48 = vadd.f32 %v503_v42, %v489_v41  ;;  %v518_v49 = vmul.f32 %v517_v45, %v515_v43 }
  0x9a   :  { %v543_v0 = vadd.f32 1e-10, %v542_v46 }
  0x9b   :  { %v530_v50 = vmax.f32 %v529_v47, 0.0  ;;  %v519_v52 = vadd.f32 %v518_v49, %v504_v48 }
  0x9c   :  { %724 = vlog2.f32 %v543_v0 }
  0x9d   :  { %v533_v53 = vmul.f32 %v532_v51, %v530_v50 }
  0x9f   :  { %v534_v1 = vadd.f32 %v533_v53, %v519_v52 }
  0xa1   :  { %v537_v55 = vadd.f32 %v536_v54, %v534_v1 }
  0xa6   :  { %v725_v36 = vpop.eup %724 }
  0xa7   :  { %v545_v56 = vmul.f32 0.6931472, %v725_v36 }
  0xa9   :  { %v546_v57 = vsub.f32 0.0, %v545_v56 }
  0xab   :  { %v547_v59 = vadd.f32 %v546_v57, %v537_v55 }
  0xad   :  { %v550_v60 = vmul.f32 %v549_v58, %v547_v59 }
  0xaf   :  { %726 = vtanh.f32 %v550_v60 }
  0xb9   :  { %v727_v61 = vpop.eup %726 }
  0xba   :  { %v552_v62 = vmul.f32 0.5, %v727_v61 }
  0xbc   :  { %v553_v63 = vadd.f32 0.5, %v552_v62 }
  0xbe   :  { %554 = vst [vmem:[#allocation10] sm:$0xff] %v553_v63 }
  0xbf   :  { %815 = shalt.err (!%p812_p3)
}
  0xc0   :  { %s816_s29 = scalar_lea.hbm %s1392_s5, 128 }
  0xc1   :  { %p817_p4 = scmp.ne.s32.totalorder %s1392_s5, %s816_s29  ;;  %p820_p5 = scmp.lt.u32.totalorder %s816_s29, %s1392_s5 }
  0xc3   :  { %p822_p6 = pnand %p820_p5, %p817_p4 }
  0xc5   :  { %825 = shalt.err (!%p822_p6)
}
  0xc6   :  { %574 = dma.vmem_to_hbm [thread:$0]  %s572_s25, 128, %s1392_s5, [#allocation11]  }
  0xc7   :  { %832 = dma.done.wait [#allocation6], 128  }
  0xc8   :  { %833 = vsyncadd [#allocation6], 4294967168 }
  0xc9   :  { %834 = dma.done.wait [#allocation11], 128  }
  0xca   :  { %835 = vsyncadd [#allocation11], 4294967168 }
  0xcb   :  { %581 = vsyncpa [#allocation5], 1 }
  0xcc   :  { %582 = vsyncpa [#allocation8], 1 }
  0xcd   :  { %583 = vsyncpa [#allocation6], 1 }
  0xce   :  { %584 = vsyncpa [#allocation11], 1 }

</bundles_post_ra>
